<compile_context>
chip_gen: v7x
topology: tpu7x:2x2x1
jax: 0.10.0
libtpu: 0.0.40
codegen_flags: <defaults>
</compile_context>

<pallas_src>
import jax
import jax.numpy as jnp
from jax.experimental import pallas as pl
from jax.experimental.pallas import tpu as pltpu


BT = 32                      # samples per grid step (batch tile)
P1 = 176                     # conv1 pooled positions/sample, padded 169 -> 176
VMEM_LIMIT = 32 * 1024 * 1024


# ----------------------------------------------------------------------------
# Pallas kernels
# ----------------------------------------------------------------------------
def _conv1_pool_kernel(p_ref, w_ref, b_ref, o_ref):
    """conv1 + bias + ReLU + fused 2x2 maxpool; channel-major / lane-dense.

    p_ref: (4, 9, M) bf16  patches: axis0 = pool offset, axis1 = 3x3 tap,
                           lane index = sample*P1 + pooled position
    w_ref: (32, 9)   bf16  conv1 weights w[c, dy*3+dx]
    b_ref: (32, 1)   f32
    o_ref: (32, M)   bf16  pooled conv1 activations (channel-major)
    """
    w = w_ref[...]
    s = jnp.dot(w, p_ref[0], preferred_element_type=jnp.float32)
    for q in range(1, 4):
        s = jnp.maximum(
            s, jnp.dot(w, p_ref[q], preferred_element_type=jnp.float32))
    o_ref[...] = jnp.maximum(s + b_ref[...], 0.0).astype(o_ref.dtype)


def _conv2_pool_kernel(p_ref, w_ref, b_ref, o_ref):
    """conv2 + bias + ReLU + fused 2x2 maxpool (bf16 MXU, f32 accumulate).

    p_ref: (4, M, 288) bf16  patches: axis0 = pool offset,
                             rows = (sample, pooled pos), cols = (tap, cin)
    w_ref: (288, 64)   bf16
    b_ref: (1, 64)     f32
    o_ref: (M, 64)     bf16
    """
    w = w_ref[...]
    s = jnp.dot(p_ref[0], w, preferred_element_type=jnp.float32)
    for q in range(1, 4):
        s = jnp.maximum(
            s, jnp.dot(p_ref[q], w, preferred_element_type=jnp.float32))
    o_ref[...] = jnp.maximum(s + b_ref[...], 0.0).astype(o_ref.dtype)


def _fc_tail_kernel(x_ref, w1_ref, b1_ref, w2_ref, b2_ref, o_ref):
    """fc1 + bias + ReLU + fc2 + bias, fused; lane-dense (128-wide) output."""
    h = jnp.dot(x_ref[...], w1_ref[...], preferred_element_type=jnp.float32)
    h = jnp.maximum(h + b1_ref[...], 0.0)
    # TODO(synk): nn.Dropout(0.5) implemented as identity (eval semantics);
    #             PyTorch training-mode RNG is not reproducible here.
    h = h.astype(jnp.bfloat16)
    o_ref[...] = (jnp.dot(h, w2_ref[...], preferred_element_type=jnp.float32)
                  + b2_ref[...])


# ----------------------------------------------------------------------------
# pallas_call wrappers (batch-tiled grids, resident weights)
# ----------------------------------------------------------------------------
def conv1_pool_call(p1, w1m, b1, n, bt):
    m_full = p1.shape[-1]                      # n * P1
    m_blk = bt * P1
    return pl.pallas_call(
        _conv1_pool_kernel,
        out_shape=jax.ShapeDtypeStruct((32, m_full), jnp.bfloat16),
        grid=(n // bt,),
        in_specs=[
            pl.BlockSpec((4, 9, m_blk), lambda t: (0, 0, t)),
            pl.BlockSpec((32, 9), lambda t: (0, 0)),
            pl.BlockSpec((32, 1), lambda t: (0, 0)),
        ],
        out_specs=pl.BlockSpec((32, m_blk), lambda t: (0, t)),
        compiler_params=pltpu.CompilerParams(
            dimension_semantics=("parallel",),
            vmem_limit_bytes=VMEM_LIMIT),
    )(p1, w1m, b1)


def conv2_pool_call(p2, w2m, b2, n, bt):
    m_full = p2.shape[1]                       # n * 25
    m_blk = bt * 25
    return pl.pallas_call(
        _conv2_pool_kernel,
        out_shape=jax.ShapeDtypeStruct((m_full, 64), jnp.bfloat16),
        grid=(n // bt,),
        in_specs=[
            pl.BlockSpec((4, m_blk, 288), lambda t: (0, t, 0)),
            pl.BlockSpec((288, 64), lambda t: (0, 0)),
            pl.BlockSpec((1, 64), lambda t: (0, 0)),
        ],
        out_specs=pl.BlockSpec((m_blk, 64), lambda t: (t, 0)),
        compiler_params=pltpu.CompilerParams(
            dimension_semantics=("parallel",),
            vmem_limit_bytes=VMEM_LIMIT),
    )(p2, w2m, b2)


def fc_tail_call(x, w1, b1, w2p, b2p):
    n, k1 = x.shape
    h = w1.shape[1]                            # 128
    npad = w2p.shape[1]                        # 128 (padded from 10)
    if n <= 512:
        tm = n
    else:                                      # n is a multiple of BT here
        tm = 32
        for cand in (512, 256, 128, 64):
            if n % cand == 0:
                tm = cand
                break
    return pl.pallas_call(
        _fc_tail_kernel,
        out_shape=jax.ShapeDtypeStruct((n, npad), jnp.float32),
        grid=(n // tm,),
        in_specs=[
            pl.BlockSpec((tm, k1), lambda i: (i, 0)),
            pl.BlockSpec((k1, h), lambda i: (0, 0)),
            pl.BlockSpec((1, h), lambda i: (0, 0)),
            pl.BlockSpec((h, npad), lambda i: (0, 0)),
            pl.BlockSpec((1, npad), lambda i: (0, 0)),
        ],
        out_specs=pl.BlockSpec((tm, npad), lambda i: (i, 0)),
        compiler_params=pltpu.CompilerParams(
            dimension_semantics=("parallel",),
            vmem_limit_bytes=VMEM_LIMIT),
    )(x, w1, b1, w2p, b2p)


# ----------------------------------------------------------------------------
# Wrapper glue: pooled-order im2col patch construction (plain JAX / XLA)
# ----------------------------------------------------------------------------
def _conv1_pool_patches(x):
    """x: (N, 28, 28) f32 -> (4, 9, N*P1) bf16 patches for the channel-major
    conv1 matmul: axis0 = pool offset (py*2+px), axis1 = tap (dy*3+dx),
    lane index = b*P1 + (i*13 + j) for pooled output position (i, j)."""
    n = x.shape[0]
    offs = []
    for py in range(2):
        for px in range(2):
            taps = []
            for dy in range(3):
                for dx in range(3):
                    r0, c0 = py + dy, px + dx
                    t = x[:, r0:r0 + 26:2, c0:c0 + 26:2].reshape(n, 169)
                    t = jnp.pad(t, ((0, 0), (0, P1 - 169)))
                    taps.append(t.reshape(n * P1))
            offs.append(jnp.stack(taps, axis=0))              # (9, N*P1)
    return jnp.stack(offs, axis=0).astype(jnp.bfloat16)        # (4, 9, N*P1)


def _conv2_pool_patches(pooled1):
    """pooled1: (N, 13, 13, 32) bf16 -> (4, N*25, 288) bf16 patches;
    row = b*25 + i*5 + j (pooled pos), col = (dy*3+dx)*32 + cin."""
    n = pooled1.shape[0]
    offs = []
    for py in range(2):
        for px in range(2):
            taps = []
            for dy in range(3):
                for dx in range(3):
                    r0, c0 = py + dy, px + dx
                    taps.append(pooled1[:, r0:r0 + 10:2, c0:c0 + 10:2, :])
            offs.append(jnp.concatenate(taps, axis=-1).reshape(n * 25, 288))
    return jnp.stack(offs, axis=0)                              # (4, N*25, 288)


# ----------------------------------------------------------------------------
# Forward pass
# ----------------------------------------------------------------------------
def mnist_forward(x_nchw, pp, bt=BT):
    n0 = x_nchw.shape[0]
    if n0 >= bt:
        n = ((n0 + bt - 1) // bt) * bt        # pad batch to a multiple of Bt
    else:
        n, bt = n0, n0                        # single full-size block
    x = x_nchw.reshape(n0, 28, 28).astype(jnp.float32)
    if n != n0:
        x = jnp.pad(x, ((0, n - n0), (0, 0), (0, 0)))

    p1 = _conv1_pool_patches(x)                                # (4, 9, n*P1)
    pooled1_cm = conv1_pool_call(p1, pp["w1m"], pp["b1"], n, bt)   # (32, n*P1)
    pooled1 = (pooled1_cm.reshape(32, n, P1)[:, :, :169]
               .reshape(32, n, 13, 13).transpose(1, 2, 3, 0))   # (n,13,13,32)

    p2 = _conv2_pool_patches(pooled1)                           # (4, n*25, 288)
    pooled2 = conv2_pool_call(p2, pp["w2m"], pp["b2"], n, bt)   # (n*25, 64)

    flat = pooled2.reshape(n, 25 * 64)                          # NHWC flatten
    logits = fc_tail_call(flat, pp["fw1m"], pp["fb1"],
                          pp["fw2m"], pp["fb2"])                # (n, 128) f32
    return logits[:n0, :10]


# ----------------------------------------------------------------------------
# Parameters: raw PyTorch-layout init + one-time re-layout (hoisted from fwd)
# ----------------------------------------------------------------------------
def init_params(key):
    ks = jax.random.split(key, 8)
    s = 0.05
    return {
        "w1": jax.random.normal(ks[0], (32, 1, 3, 3), jnp.float32) * s,
        "b1": jax.random.normal(ks[1], (32,), jnp.float32) * s,
        "w2": jax.random.normal(ks[2], (64, 32, 3, 3), jnp.float32) * s,
        "b2": jax.random.normal(ks[3], (64,), jnp.float32) * s,
        "fw1": jax.random.normal(ks[4], (128, 64 * 5 * 5), jnp.float32) * s,
        "fb1": jax.random.normal(ks[5], (128,), jnp.float32) * s,
        "fw2": jax.random.normal(ks[6], (10, 128), jnp.float32) * s,
        "fb2": jax.random.normal(ks[7], (10,), jnp.float32) * s,
    }


def prepare_params(raw):
    """One-time weight re-layouts (done at init, not per forward call)."""
    # conv1: (32,1,3,3) -> (32, 9), column index dy*3+dx, bf16 (MXU LHS)
    w1m = raw["w1"].reshape(32, 9).astype(jnp.bfloat16)
    # conv2: (64,32,3,3) -> (288,64) with row index (dy*3+dx)*32+cin, bf16
    w2m = jnp.transpose(raw["w2"], (2, 3, 1, 0)).reshape(288, 64).astype(jnp.bfloat16)
    # fc1: permute columns from PyTorch (C,H,W) flatten order to our (H,W,C)
    fw1m = (raw["fw1"].reshape(128, 64, 25).transpose(0, 2, 1)
            .reshape(128, 1600).T.astype(jnp.bfloat16))              # (1600,128)
    # fc2: transpose + zero-pad out dim 10 -> 128 for lane-dense stores
    fw2m = jnp.zeros((128, 128), jnp.bfloat16).at[:, :10].set(
        raw["fw2"].T.astype(jnp.bfloat16))
    fb2m = jnp.zeros((1, 128), jnp.float32).at[0, :10].set(raw["fb2"])
    return {
        "w1m": w1m, "b1": raw["b1"].reshape(32, 1).astype(jnp.float32),
        "w2m": w2m, "b2": raw["b2"].reshape(1, 64).astype(jnp.float32),
        "fw1m": fw1m, "fb1": raw["fb1"].reshape(1, 128).astype(jnp.float32),
        "fw2m": fw2m, "fb2": fb2m,
    }


if __name__ == "__main__":
    key = jax.random.PRNGKey(0)
    k_x, k_p = jax.random.split(key)
    # MNIST-shaped input (28x28 required by the 64*5*5 flatten); small batch.
    x = jax.random.normal(k_x, (2, 1, 28, 28), jnp.float32)
    params = prepare_params(init_params(k_p))     # weight re-layout hoisted here

    fwd = jax.jit(mnist_forward)
    out = jax.block_until_ready(fwd(x, params))

    assert out.shape == (2, 10) and out.dtype == jnp.float32
    assert bool(jnp.all(jnp.isfinite(out)))
    print("KERNEL_OK")
</pallas_src>

<mosaic_0001>
module attributes {stable_mosaic.version = 11 : i64} {
  func.func @_conv1_pool_kernel(%arg0: i32, %arg1: memref<4x9x352xbf16, #tpu.memory_space<vmem>>, %arg2: memref<32x9xbf16, #tpu.memory_space<vmem>>, %arg3: memref<32x1xf32, #tpu.memory_space<vmem>>, %arg4: memref<32x352xbf16, #tpu.memory_space<vmem>>) attributes {dimension_semantics = [#tpu.dimension_semantics<parallel>], iteration_bounds = array<i64: 1>, scalar_prefetch = 0 : i64, scratch_operands = 0 : i64, tpu.core_type = #tpu.core_type<tc>, window_params = [{transform_indices = @transform_0, window_bounds = array<i64: 4, 9, 352>}, {pipeline_mode = #tpu.pipeline_mode<synchronous>, transform_indices = @transform_1, window_bounds = array<i64: 32, 9>}, {pipeline_mode = #tpu.pipeline_mode<synchronous>, transform_indices = @transform_2, window_bounds = array<i64: 32, 1>}, {transform_indices = @transform_3, window_bounds = array<i64: 32, 352>}]} {
    %c0 = arith.constant 0 : index
    %c0_0 = arith.constant 0 : index
    %0 = vector.load %arg2[%c0, %c0_0] : memref<32x9xbf16, #tpu.memory_space<vmem>>, vector<32x9xbf16>
    %c0_1 = arith.constant 0 : index
    %c0_2 = arith.constant 0 : index
    %c0_3 = arith.constant 0 : index
    %1 = vector.load %arg1[%c0_1, %c0_2, %c0_3] : memref<4x9x352xbf16, #tpu.memory_space<vmem>>, vector<1x9x352xbf16>
    %2 = vector.shape_cast %1 : vector<1x9x352xbf16> to vector<9x352xbf16>
    %cst = arith.constant dense<0.000000e+00> : vector<32x352xf32>
    %3 = tpu.matmul %0, %2, %cst {dimension_numbers = #tpu.dot_dimension_numbers<[1], [0], [0], [1], [0, 0, 1, 1], [], []>} : vector<32x9xbf16>, vector<9x352xbf16>, vector<32x352xf32> -> vector<32x352xf32>
    %c1 = arith.constant 1 : index
    %c0_4 = arith.constant 0 : index
    %c0_5 = arith.constant 0 : index
    %4 = vector.load %arg1[%c1, %c0_4, %c0_5] : memref<4x9x352xbf16, #tpu.memory_space<vmem>>, vector<1x9x352xbf16>
    %5 = vector.shape_cast %4 : vector<1x9x352xbf16> to vector<9x352xbf16>
    %cst_6 = arith.constant dense<0.000000e+00> : vector<32x352xf32>
    %6 = tpu.matmul %0, %5, %cst_6 {dimension_numbers = #tpu.dot_dimension_numbers<[1], [0], [0], [1], [0, 0, 1, 1], [], []>} : vector<32x9xbf16>, vector<9x352xbf16>, vector<32x352xf32> -> vector<32x352xf32>
    %7 = arith.maximumf %3, %6 : vector<32x352xf32>
    %c2 = arith.constant 2 : index
    %c0_7 = arith.constant 0 : index
    %c0_8 = arith.constant 0 : index
    %8 = vector.load %arg1[%c2, %c0_7, %c0_8] : memref<4x9x352xbf16, #tpu.memory_space<vmem>>, vector<1x9x352xbf16>
    %9 = vector.shape_cast %8 : vector<1x9x352xbf16> to vector<9x352xbf16>
    %cst_9 = arith.constant dense<0.000000e+00> : vector<32x352xf32>
    %10 = tpu.matmul %0, %9, %cst_9 {dimension_numbers = #tpu.dot_dimension_numbers<[1], [0], [0], [1], [0, 0, 1, 1], [], []>} : vector<32x9xbf16>, vector<9x352xbf16>, vector<32x352xf32> -> vector<32x352xf32>
    %11 = arith.maximumf %7, %10 : vector<32x352xf32>
    %c3 = arith.constant 3 : index
    %c0_10 = arith.constant 0 : index
    %c0_11 = arith.constant 0 : index
    %12 = vector.load %arg1[%c3, %c0_10, %c0_11] : memref<4x9x352xbf16, #tpu.memory_space<vmem>>, vector<1x9x352xbf16>
    %13 = vector.shape_cast %12 : vector<1x9x352xbf16> to vector<9x352xbf16>
    %cst_12 = arith.constant dense<0.000000e+00> : vector<32x352xf32>
    %14 = tpu.matmul %0, %13, %cst_12 {dimension_numbers = #tpu.dot_dimension_numbers<[1], [0], [0], [1], [0, 0, 1, 1], [], []>} : vector<32x9xbf16>, vector<9x352xbf16>, vector<32x352xf32> -> vector<32x352xf32>
    %15 = arith.maximumf %11, %14 : vector<32x352xf32>
    %c0_13 = arith.constant 0 : index
    %c0_14 = arith.constant 0 : index
    %16 = vector.load %arg3[%c0_13, %c0_14] : memref<32x1xf32, #tpu.memory_space<vmem>>, vector<32x1xf32>
    %17 = vector.broadcast %16 : vector<32x1xf32> to vector<32x352xf32>
    %18 = arith.addf %15, %17 : vector<32x352xf32>
    %cst_15 = arith.constant 0.000000e+00 : f32
    %19 = vector.broadcast %cst_15 : f32 to vector<32x352xf32>
    %20 = arith.maximumf %18, %19 : vector<32x352xf32>
    %21 = arith.truncf %20 : vector<32x352xf32> to vector<32x352xbf16>
    %c0_16 = arith.constant 0 : index
    %c0_17 = arith.constant 0 : index
    %22 = vector.load %arg4[%c0_16, %c0_17] : memref<32x352xbf16, #tpu.memory_space<vmem>>, vector<32x352xbf16>
    tpu.vector_store %arg4[%c0_16, %c0_17], %21 {strides = array<i32>} : memref<32x352xbf16, #tpu.memory_space<vmem>>, vector<32x352xbf16>,
    return
  }
  func.func @transform_0(%arg0: i32) -> (i32, i32, i32) {
    %c0_i32 = arith.constant 0 : i32
    %c0_i32_0 = arith.constant 0 : i32
    %c0_i32_1 = arith.constant 0 : i32
    return %c0_i32, %c0_i32_0, %arg0 : i32, i32, i32
  }
  func.func @transform_1(%arg0: i32) -> (i32, i32) {
    %c0_i32 = arith.constant 0 : i32
    %c0_i32_0 = arith.constant 0 : i32
    %c0_i32_1 = arith.constant 0 : i32
    return %c0_i32, %c0_i32_0 : i32, i32
  }
  func.func @transform_2(%arg0: i32) -> (i32, i32) {
    %c0_i32 = arith.constant 0 : i32
    %c0_i32_0 = arith.constant 0 : i32
    %c0_i32_1 = arith.constant 0 : i32
    return %c0_i32, %c0_i32_0 : i32, i32
  }
  func.func @transform_3(%arg0: i32) -> (i32, i32) {
    %c0_i32 = arith.constant 0 : i32
    %c0_i32_0 = arith.constant 0 : i32
    return %c0_i32, %arg0 : i32, i32
  }
}

module attributes {stable_mosaic.version = 11 : i64} {
  func.func @_conv2_pool_kernel(%arg0: i32, %arg1: memref<4x50x288xbf16, #tpu.memory_space<vmem>>, %arg2: memref<288x64xbf16, #tpu.memory_space<vmem>>, %arg3: memref<1x64xf32, #tpu.memory_space<vmem>>, %arg4: memref<50x64xbf16, #tpu.memory_space<vmem>>) attributes {dimension_semantics = [#tpu.dimension_semantics<parallel>], iteration_bounds = array<i64: 1>, scalar_prefetch = 0 : i64, scratch_operands = 0 : i64, tpu.core_type = #tpu.core_type<tc>, window_params = [{transform_indices = @transform_0, window_bounds = array<i64: 4, 50, 288>}, {pipeline_mode = #tpu.pipeline_mode<synchronous>, transform_indices = @transform_1, window_bounds = array<i64: 288, 64>}, {pipeline_mode = #tpu.pipeline_mode<synchronous>, transform_indices = @transform_2, window_bounds = array<i64: 1, 64>}, {transform_indices = @transform_3, window_bounds = array<i64: 50, 64>}]} {
    %c0 = arith.constant 0 : index
    %c0_0 = arith.constant 0 : index
    %0 = vector.load %arg2[%c0, %c0_0] : memref<288x64xbf16, #tpu.memory_space<vmem>>, vector<288x64xbf16>
    %c0_1 = arith.constant 0 : index
    %c0_2 = arith.constant 0 : index
    %c0_3 = arith.constant 0 : index
    %1 = vector.load %arg1[%c0_1, %c0_2, %c0_3] : memref<4x50x288xbf16, #tpu.memory_space<vmem>>, vector<1x50x288xbf16>
    %2 = vector.shape_cast %1 : vector<1x50x288xbf16> to vector<50x288xbf16>
    %cst = arith.constant dense<0.000000e+00> : vector<50x64xf32>
    %3 = tpu.matmul %2, %0, %cst {dimension_numbers = #tpu.dot_dimension_numbers<[1], [0], [0], [1], [0, 0, 1, 1], [], []>} : vector<50x288xbf16>, vector<288x64xbf16>, vector<50x64xf32> -> vector<50x64xf32>
    %c1 = arith.constant 1 : index
    %c0_4 = arith.constant 0 : index
    %c0_5 = arith.constant 0 : index
    %4 = vector.load %arg1[%c1, %c0_4, %c0_5] : memref<4x50x288xbf16, #tpu.memory_space<vmem>>, vector<1x50x288xbf16>
    %5 = vector.shape_cast %4 : vector<1x50x288xbf16> to vector<50x288xbf16>
    %cst_6 = arith.constant dense<0.000000e+00> : vector<50x64xf32>
    %6 = tpu.matmul %5, %0, %cst_6 {dimension_numbers = #tpu.dot_dimension_numbers<[1], [0], [0], [1], [0, 0, 1, 1], [], []>} : vector<50x288xbf16>, vector<288x64xbf16>, vector<50x64xf32> -> vector<50x64xf32>
    %7 = arith.maximumf %3, %6 : vector<50x64xf32>
    %c2 = arith.constant 2 : index
    %c0_7 = arith.constant 0 : index
    %c0_8 = arith.constant 0 : index
    %8 = vector.load %arg1[%c2, %c0_7, %c0_8] : memref<4x50x288xbf16, #tpu.memory_space<vmem>>, vector<1x50x288xbf16>
    %9 = vector.shape_cast %8 : vector<1x50x288xbf16> to vector<50x288xbf16>
    %cst_9 = arith.constant dense<0.000000e+00> : vector<50x64xf32>
    %10 = tpu.matmul %9, %0, %cst_9 {dimension_numbers = #tpu.dot_dimension_numbers<[1], [0], [0], [1], [0, 0, 1, 1], [], []>} : vector<50x288xbf16>, vector<288x64xbf16>, vector<50x64xf32> -> vector<50x64xf32>
    %11 = arith.maximumf %7, %10 : vector<50x64xf32>
    %c3 = arith.constant 3 : index
    %c0_10 = arith.constant 0 : index
    %c0_11 = arith.constant 0 : index
    %12 = vector.load %arg1[%c3, %c0_10, %c0_11] : memref<4x50x288xbf16, #tpu.memory_space<vmem>>, vector<1x50x288xbf16>
    %13 = vector.shape_cast %12 : vector<1x50x288xbf16> to vector<50x288xbf16>
    %cst_12 = arith.constant dense<0.000000e+00> : vector<50x64xf32>
    %14 = tpu.matmul %13, %0, %cst_12 {dimension_numbers = #tpu.dot_dimension_numbers<[1], [0], [0], [1], [0, 0, 1, 1], [], []>} : vector<50x288xbf16>, vector<288x64xbf16>, vector<50x64xf32> -> vector<50x64xf32>
    %15 = arith.maximumf %11, %14 : vector<50x64xf32>
    %c0_13 = arith.constant 0 : index
    %c0_14 = arith.constant 0 : index
    %16 = vector.load %arg3[%c0_13, %c0_14] : memref<1x64xf32, #tpu.memory_space<vmem>>, vector<1x64xf32>
    %17 = vector.broadcast %16 : vector<1x64xf32> to vector<50x64xf32>
    %18 = arith.addf %15, %17 : vector<50x64xf32>
    %cst_15 = arith.constant 0.000000e+00 : f32
    %19 = vector.broadcast %cst_15 : f32 to vector<50x64xf32>
    %20 = arith.maximumf %18, %19 : vector<50x64xf32>
    %21 = arith.truncf %20 : vector<50x64xf32> to vector<50x64xbf16>
    %c0_16 = arith.constant 0 : index
    %c0_17 = arith.constant 0 : index
    %22 = vector.load %arg4[%c0_16, %c0_17] : memref<50x64xbf16, #tpu.memory_space<vmem>>, vector<50x64xbf16>
    tpu.vector_store %arg4[%c0_16, %c0_17], %21 {strides = array<i32>} : memref<50x64xbf16, #tpu.memory_space<vmem>>, vector<50x64xbf16>,
    return
  }
  func.func @transform_0(%arg0: i32) -> (i32, i32, i32) {
    %c0_i32 = arith.constant 0 : i32
    %c0_i32_0 = arith.constant 0 : i32
    %c0_i32_1 = arith.constant 0 : i32
    return %c0_i32, %arg0, %c0_i32_0 : i32, i32, i32
  }
  func.func @transform_1(%arg0: i32) -> (i32, i32) {
    %c0_i32 = arith.constant 0 : i32
    %c0_i32_0 = arith.constant 0 : i32
    %c0_i32_1 = arith.constant 0 : i32
    return %c0_i32, %c0_i32_0 : i32, i32
  }
  func.func @transform_2(%arg0: i32) -> (i32, i32) {
    %c0_i32 = arith.constant 0 : i32
    %c0_i32_0 = arith.constant 0 : i32
    %c0_i32_1 = arith.constant 0 : i32
    return %c0_i32, %c0_i32_0 : i32, i32
  }
  func.func @transform_3(%arg0: i32) -> (i32, i32) {
    %c0_i32 = arith.constant 0 : i32
    %c0_i32_0 = arith.constant 0 : i32
    return %arg0, %c0_i32 : i32, i32
  }
}

module attributes {stable_mosaic.version = 11 : i64} {
  func.func @_fc_tail_kernel(%arg0: i32, %arg1: memref<2x1600xbf16, #tpu.memory_space<vmem>>, %arg2: memref<1600x128xbf16, #tpu.memory_space<vmem>>, %arg3: memref<1x128xf32, #tpu.memory_space<vmem>>, %arg4: memref<128x128xbf16, #tpu.memory_space<vmem>>, %arg5: memref<1x128xf32, #tpu.memory_space<vmem>>, %arg6: memref<2x128xf32, #tpu.memory_space<vmem>>) attributes {dimension_semantics = [#tpu.dimension_semantics<parallel>], iteration_bounds = array<i64: 1>, scalar_prefetch = 0 : i64, scratch_operands = 0 : i64, tpu.core_type = #tpu.core_type<tc>, window_params = [{transform_indices = @transform_0, window_bounds = array<i64: 2, 1600>}, {pipeline_mode = #tpu.pipeline_mode<synchronous>, transform_indices = @transform_1, window_bounds = array<i64: 1600, 128>}, {pipeline_mode = #tpu.pipeline_mode<synchronous>, transform_indices = @transform_2, window_bounds = array<i64: 1, 128>}, {pipeline_mode = #tpu.pipeline_mode<synchronous>, transform_indices = @transform_3, window_bounds = array<i64: 128, 128>}, {pipeline_mode = #tpu.pipeline_mode<synchronous>, transform_indices = @transform_4, window_bounds = array<i64: 1, 128>}, {transform_indices = @transform_5, window_bounds = array<i64: 2, 128>}]} {
    %c0 = arith.constant 0 : index
    %c0_0 = arith.constant 0 : index
    %0 = vector.load %arg1[%c0, %c0_0] : memref<2x1600xbf16, #tpu.memory_space<vmem>>, vector<2x1600xbf16>
    %c0_1 = arith.constant 0 : index
    %c0_2 = arith.constant 0 : index
    %1 = vector.load %arg2[%c0_1, %c0_2] : memref<1600x128xbf16, #tpu.memory_space<vmem>>, vector<1600x128xbf16>
    %cst = arith.constant dense<0.000000e+00> : vector<2x128xf32>
    %2 = tpu.matmul %0, %1, %cst {dimension_numbers = #tpu.dot_dimension_numbers<[1], [0], [0], [1], [0, 0, 1, 1], [], []>} : vector<2x1600xbf16>, vector<1600x128xbf16>, vector<2x128xf32> -> vector<2x128xf32>
    %c0_3 = arith.constant 0 : index
    %c0_4 = arith.constant 0 : index
    %3 = vector.load %arg3[%c0_3, %c0_4] : memref<1x128xf32, #tpu.memory_space<vmem>>, vector<1x128xf32>
    %4 = vector.broadcast %3 : vector<1x128xf32> to vector<2x128xf32>
    %5 = arith.addf %2, %4 : vector<2x128xf32>
    %cst_5 = arith.constant 0.000000e+00 : f32
    %6 = vector.broadcast %cst_5 : f32 to vector<2x128xf32>
    %7 = arith.maximumf %5, %6 : vector<2x128xf32>
    %8 = arith.truncf %7 : vector<2x128xf32> to vector<2x128xbf16>
    %c0_6 = arith.constant 0 : index
    %c0_7 = arith.constant 0 : index
    %9 = vector.load %arg4[%c0_6, %c0_7] : memref<128x128xbf16, #tpu.memory_space<vmem>>, vector<128x128xbf16>
    %cst_8 = arith.constant dense<0.000000e+00> : vector<2x128xf32>
    %10 = tpu.matmul %8, %9, %cst_8 {dimension_numbers = #tpu.dot_dimension_numbers<[1], [0], [0], [1], [0, 0, 1, 1], [], []>} : vector<2x128xbf16>, vector<128x128xbf16>, vector<2x128xf32> -> vector<2x128xf32>
    %c0_9 = arith.constant 0 : index
    %c0_10 = arith.constant 0 : index
    %11 = vector.load %arg5[%c0_9, %c0_10] : memref<1x128xf32, #tpu.memory_space<vmem>>, vector<1x128xf32>
    %12 = vector.broadcast %11 : vector<1x128xf32> to vector<2x128xf32>
    %13 = arith.addf %10, %12 : vector<2x128xf32>
    %c0_11 = arith.constant 0 : index
    %c0_12 = arith.constant 0 : index
    %14 = vector.load %arg6[%c0_11, %c0_12] : memref<2x128xf32, #tpu.memory_space<vmem>>, vector<2x128xf32>
    tpu.vector_store %arg6[%c0_11, %c0_12], %13 {strides = array<i32>} : memref<2x128xf32, #tpu.memory_space<vmem>>, vector<2x128xf32>,
    return
  }
  func.func @transform_0(%arg0: i32) -> (i32, i32) {
    %c0_i32 = arith.constant 0 : i32
    %c0_i32_0 = arith.constant 0 : i32
    return %arg0, %c0_i32 : i32, i32
  }
  func.func @transform_1(%arg0: i32) -> (i32, i32) {
    %c0_i32 = arith.constant 0 : i32
    %c0_i32_0 = arith.constant 0 : i32
    %c0_i32_1 = arith.constant 0 : i32
    return %c0_i32, %c0_i32_0 : i32, i32
  }
  func.func @transform_2(%arg0: i32) -> (i32, i32) {
    %c0_i32 = arith.constant 0 : i32
    %c0_i32_0 = arith.constant 0 : i32
    %c0_i32_1 = arith.constant 0 : i32
    return %c0_i32, %c0_i32_0 : i32, i32
  }
  func.func @transform_3(%arg0: i32) -> (i32, i32) {
    %c0_i32 = arith.constant 0 : i32
    %c0_i32_0 = arith.constant 0 : i32
    %c0_i32_1 = arith.constant 0 : i32
    return %c0_i32, %c0_i32_0 : i32, i32
  }
  func.func @transform_4(%arg0: i32) -> (i32, i32) {
    %c0_i32 = arith.constant 0 : i32
    %c0_i32_0 = arith.constant 0 : i32
    %c0_i32_1 = arith.constant 0 : i32
    return %c0_i32, %c0_i32_0 : i32, i32
  }
  func.func @transform_5(%arg0: i32) -> (i32, i32) {
    %c0_i32 = arith.constant 0 : i32
    %c0_i32_0 = arith.constant 0 : i32
    return %arg0, %c0_i32 : i32, i32
  }
}

</mosaic_0001>

<bundles_post_ra>
// kernel: mnist_forward.3
= control target key start
LH: loop header
LB: loop body
LE: loop exit
PB: predicated region body
PF: predicated region fallthrough
CT: control target
= control target key end

     0   :  { %vm53_vm0 = vcmask 1043456   ;;  %vm54_vm1 = vcmask 1044480   ;;  %v808_v1 = vmov 0   ;;  %v809_v2 = vmov 65535   ;;  %s977_s0 = inlined_call_operand.vmem [shape: bf16[4,9,352], index: 0, kind: input, shape index: {}]   ;;  %s978_s1 = inlined_call_operand.vmem [shape: bf16[32,9], index: 1, kind: input, shape index: {}]   ;;  %s979_s2 = inlined_call_operand.vmem [shape: f32[32,1], index: 2, kind: input, shape index: {}]   ;;  %s980_s3 = inlined_call_operand.vmem [shape: bf16[32,352], index: 3, kind: output, shape index: {}]  }
   0x1   :  { %v790_v0 = vld [vmem:[%s977_s0 + $0x4] ss:$12 sps:$4 sm:$0x1f]   ;;  %98 = vmatprep.mubr.bf16.mxu0 %v808_v1  ;;  %788 = vset.pattern.permute.xlu0 %v808_v1  ;;  %v55_v3 = vsel %vm53_vm0, 4294967295, %v809_v2  ;;  %vm46_vm2 = vcmask 72704   ;;  %v856_v10 = vld [vmem:[%s978_s1 + $0x8] sm:$0xff]  }
   0x2   :  { %v838_v4 = vld [vmem:[%s978_s1] sm:$0xff]   ;;  %789 = vset.pattern.permute.xlu1 %v808_v1  ;;  %v841_v5 = vsel %vm54_vm1, %v55_v3, 0  ;;  %v792_v6 = vld [vmem:[%s977_s0 + $0x8] ss:$12 sps:$4 sm:$0x1f]   ;;  %v594_v27 = vld [vmem:[%s979_s2 + $0x18] sm:$0xff] }
   0x3   :  { %v61_v7 = vand.u32 %v790_v0, %v841_v5  ;;  %v793_v8 = vld [vmem:[%s977_s0] ss:$12 sps:$4 sm:$0x1f]   ;;  %v64_v9 = vand.u32 %v792_v6, %v841_v5  ;;  %764 = vmatprep.mubr.msk.bf16.mxu1 %vm46_vm2, %v838_v4  ;;  %v796_v12 = vld [vmem:[%s977_s0 + $0x18] ss:$12 sps:$4 sm:$0x1f]  }
   0x4   :  { %v58_v11 = vand.u32 %v793_v8, %v841_v5  ;;  %v798_v13 = vld [vmem:[%s977_s0 + $0x1c] ss:$12 sps:$4 sm:$0x1f]   ;;  %v799_v14 = vld [vmem:[%s977_s0 + $0x20] ss:$12 sps:$4 sm:$0x1f]   ;;  %v187_v16 = vand.u32 %v796_v12, %v841_v5 }
   0x5   :  { %66 = vmatprep.subr.bf16.mxu0 %v61_v7  ;;  %762 = vmatprep.subr.bf16.mxu1 %v64_v9  ;;  %v190_v15 = vand.u32 %v798_v13, %v841_v5  ;;  %v193_v17 = vand.u32 %v799_v14, %v841_v5  ;;  %v800_v18 = vld [vmem:[%s977_s0 + $0x38] ss:$12 sps:$4 sm:$0x1f]   ;;  %v803_v19 = vld [vmem:[%s977_s0 + $0x34] ss:$12 sps:$4 sm:$0x1f]  }
   0x6   :  { %67 = vmatpush1.bf16.msra.mxu0 %v58_v11  ;;  %763 = vmatpush3.bf16.msra.mxu1 %v64_v9  ;;  %v334_v20 = vand.u32 %v800_v18, %v841_v5  ;;  %v806_v21 = vld [vmem:[%s977_s0 + $0x4c] ss:$12 sps:$4 sm:$0x1f]   ;;  %v331_v22 = vand.u32 %v803_v19, %v841_v5  ;;  %v591_v23 = vld [vmem:[%s979_s2] sm:$0xff]  ;;  %v593_v24 = vld [vmem:[%s979_s2 + $0x10] sm:$0xff]  ;;  %vm680_vm3 = vcmask 781312  }
   0x7   :  { %195 = vmatprep.subr.bf16.mxu1 %v190_v15  ;;  %768 = vmatprep.subr.bf16.mxu0 %v193_v17  ;;  %v472_v25 = vand.u32 %v806_v21, %v841_v5  ;;  %v592_v26 = vld [vmem:[%s979_s2 + $0x8] sm:$0xff]  ;;  %v801_v28 = vld [vmem:[%s977_s0 + $0x30] ss:$12 sps:$4 sm:$0x1f]  }
   0x8   :  { %597 = vperm.xlu0 %788, %v591_v23   ;;  %607 = vperm.xlu1 %789, %v593_v24   ;;  %v807_v29 = vld [vmem:[%s977_s0 + $0x50] ss:$12 sps:$4 sm:$0x1f]   ;;  %v328_v30 = vand.u32 %v801_v28, %v841_v5  ;;  %v804_v32 = vld [vmem:[%s977_s0 + $0x48] ss:$12 sps:$4 sm:$0x1f]  }
   0x9   :  { %697 = vmatmul.mubr.msk.bf16.vlgmr.msra.gmra.mrb[0].mxu0 %vm46_vm2, %v838_v4  ;;  %765 = vmatmul.mubr.msk.bf16.vlgmr.msra.gmra.mrb[0].mxu1 %vm46_vm2, %v856_v10  ;;  %v475_v31 = vand.u32 %v807_v29, %v841_v5  ;;  %v469_v33 = vand.u32 %v804_v32, %v841_v5 }
   0xa   :  { %196 = vmatpush1.bf16.msra.mxu1 %v187_v16  ;;  %769 = vmatpush3.bf16.msra.mxu0 %v193_v17 }
   0xb   :  { %108 = vmatprep.mubr.bf16.mxu0 %v808_v1  ;;  %227 = vmatprep.mubr.bf16.mxu1 %v808_v1 }
   0xc   :  { %774 = vmatprep.subr.bf16.mxu1 %v334_v20  ;;  %336 = vmatprep.subr.bf16.mxu0 %v331_v22 }
   0xd   :  { %602 = vperm.xlu0 %788, %v592_v26   ;;  %612 = vperm.xlu1 %789, %v594_v27  }
  0x11   :  { %698 = vmatmul.mubr.msk.bf16.gmra.mrb[4].mxu0 %vm46_vm2, %v856_v10  ;;  %708 = vmatmul.mubr.msk.bf16.vlgmr.msra.gmra.mrb[4].mxu1 %vm46_vm2, %v838_v4 }
  0x12   :  { %775 = vmatpush3.bf16.msra.mxu1 %v334_v20  ;;  %237 = vmatprep.mubr.bf16.mxu1 %v808_v1 }
  0x13   :  { %770 = vmatprep.mubr.msk.bf16.mxu0 %vm46_vm2, %v838_v4  ;;  %477 = vmatprep.subr.bf16.mxu1 %v472_v25 }
  0x19   :  { %709 = vmatmul.mubr.msk.bf16.gmra.mrb[8].mxu1 %vm46_vm2, %v856_v10  ;;  %771 = vmatmul.mubr.msk.bf16.vlgmr.msra.gmra.mrb[8].mxu0 %vm46_vm2, %v856_v10 }
  0x1a   :  { %337 = vmatpush1.bf16.msra.mxu0 %v328_v30  ;;  %368 = vmatprep.mubr.bf16.mxu0 %v808_v1 }
  0x1b   :  { %776 = vmatprep.mubr.msk.bf16.mxu1 %vm46_vm2, %v838_v4  ;;  %780 = vmatprep.subr.bf16.mxu0 %v475_v31 }
  0x21   :  { %719 = vmatmul.mubr.msk.bf16.vlgmr.msra.gmra.mrb[12].mxu0 %vm46_vm2, %v838_v4  ;;  %777 = vmatmul.mubr.msk.bf16.vlgmr.msra.gmra.mrb[12].mxu1 %vm46_vm2, %v856_v10 }
  0x22   :  { %478 = vmatpush1.bf16.msra.mxu1 %v469_v33  ;;  %781 = vmatpush3.bf16.msra.mxu0 %v475_v31 }
  0x23   :  { %378 = vmatprep.mubr.bf16.mxu0 %v808_v1  ;;  %509 = vmatprep.mubr.bf16.mxu1 %v808_v1 }
  0x29   :  { %720 = vmatmul.mubr.msk.bf16.gmra.mrb[16].mxu0 %vm46_vm2, %v856_v10  ;;  %730 = vmatmul.mubr.msk.bf16.vlgmr.msra.gmra.mrb[16].mxu1 %vm46_vm2, %v838_v4 }
  0x2a   :  { %519 = vmatprep.mubr.bf16.mxu1 %v808_v1  ;;  %782 = vmatprep.mubr.msk.bf16.mxu0 %vm46_vm2, %v838_v4 }
  0x31   :  { %731 = vmatmul.mubr.msk.bf16.gmra.mrb[20].mxu1 %vm46_vm2, %v856_v10  ;;  %783 = vmatmul.mubr.msk.bf16.vlgmr.msra.gmra.mrb[20].mxu0 %vm46_vm2, %v856_v10 }
  0x87   :  { %v944_v6 = vpop.permute.xlu0 %597 }
  0x8c   :  { %v603_v23 = vpop.permute.xlu0 %602 }
  0xdc   :  { %v100_v34 = vpop.f32.mrb[0].mxu0  ;;  %v766_v35 = vpop.f32.mrb[0].mxu1 }
  0xdd   :  { %v102_v36 = vpop.f32.mrb[1].mxu0  ;;  %v153_v37 = vpop.f32.mrb[1].mxu1 }
  0xde   :  { %v104_v38 = vpop.f32.mrb[2].mxu0  ;;  %v767_v39 = vpop.f32.mrb[2].mxu1 }
  0xdf   :  { %v106_v40 = vpop.f32.mrb[3].mxu0  ;;  %v156_v41 = vpop.f32.mrb[3].mxu1 }
  0xe4   :  { %v110_v42 = vpop.f32.mrb[4].mxu0  ;;  %v229_v43 = vpop.f32.mrb[4].mxu1 }
  0xe5   :  { %v297_v44 = vmax.f32 %v100_v34, %v229_v43  ;;  %v112_v45 = vpop.f32.mrb[5].mxu0  ;;  %v231_v46 = vpop.f32.mrb[5].mxu1 }
  0xe6   :  { %v298_v47 = vmax.f32 %v102_v36, %v231_v46  ;;  %v114_v48 = vpop.f32.mrb[6].mxu0  ;;  %v233_v49 = vpop.f32.mrb[6].mxu1 }
  0xe7   :  { %v300_v50 = vmax.f32 %v104_v38, %v233_v49  ;;  %v116_v51 = vpop.f32.mrb[7].mxu0  ;;  %v235_v52 = vpop.f32.mrb[7].mxu1 }
  0xe8   :  { %v301_v53 = vmax.f32 %v106_v40, %v235_v52  ;;  %v608_v46 = vpop.permute.xlu1 %607 }
  0xec   :  { %v239_v54 = vpop.f32.mrb[8].mxu1  ;;  %v772_v55 = vpop.f32.mrb[8].mxu0 }
  0xed   :  { %v303_v56 = vmax.f32 %v110_v42, %v239_v54  ;;  %v305_v57 = vmax.f32 %v766_v35, %v772_v55  ;;  %v241_v58 = vpop.f32.mrb[9].mxu1  ;;  %v282_v59 = vpop.f32.mrb[9].mxu0 }
  0xee   :  { %v304_v60 = vmax.f32 %v112_v45, %v241_v58  ;;  %v299_v61 = vmax.f32 %v153_v37, %v282_v59  ;;  %v243_v62 = vpop.f32.mrb[10].mxu1  ;;  %v773_v63 = vpop.f32.mrb[10].mxu0 }
  0xef   :  { %v306_v0 = vmax.f32 %v114_v48, %v243_v62  ;;  %v308_v1 = vmax.f32 %v767_v39, %v773_v63  ;;  %v245_v2 = vpop.f32.mrb[11].mxu1  ;;  %v285_v3 = vpop.f32.mrb[11].mxu0 }
  0xf0   :  { %v307_v4 = vmax.f32 %v116_v51, %v245_v2  ;;  %v302_v5 = vmax.f32 %v156_v41, %v285_v3 }
  0xf4   :  { %v370_v7 = vpop.f32.mrb[12].mxu0  ;;  %v778_v8 = vpop.f32.mrb[12].mxu1 }
  0xf5   :  { %v438_v9 = vmax.f32 %v297_v44, %v370_v7  ;;  %v446_v10 = vmax.f32 %v305_v57, %v778_v8  ;;  %v372_v11 = vpop.f32.mrb[13].mxu0  ;;  %v423_v12 = vpop.f32.mrb[13].mxu1 }
  0xf6   :  { %v439_v13 = vmax.f32 %v298_v47, %v372_v11  ;;  %v440_v14 = vmax.f32 %v299_v61, %v423_v12  ;;  %v374_v15 = vpop.f32.mrb[14].mxu0  ;;  %v779_v16 = vpop.f32.mrb[14].mxu1 }
  0xf7   :  { %v441_v17 = vmax.f32 %v300_v50, %v374_v15  ;;  %v449_v18 = vmax.f32 %v308_v1, %v779_v16  ;;  %v376_v19 = vpop.f32.mrb[15].mxu0  ;;  %v426_v20 = vpop.f32.mrb[15].mxu1 }
  0xf8   :  { %v442_v21 = vmax.f32 %v301_v53, %v376_v19  ;;  %v443_v22 = vmax.f32 %v302_v5, %v426_v20  ;;  %v613_v5 = vpop.permute.xlu1 %612 }
  0xfc   :  { %v380_v24 = vpop.f32.mrb[16].mxu0  ;;  %v511_v25 = vpop.f32.mrb[16].mxu1 }
  0xfd   :  { %v444_v26 = vmax.f32 %v303_v56, %v380_v24  ;;  %v579_v27 = vmax.f32 %v438_v9, %v511_v25  ;;  %v382_v28 = vpop.f32.mrb[17].mxu0  ;;  %v513_v29 = vpop.f32.mrb[17].mxu1 }
  0xfe   :  { %v445_v30 = vmax.f32 %v304_v60, %v382_v28  ;;  %v580_v31 = vmax.f32 %v439_v13, %v513_v29  ;;  %v384_v32 = vpop.f32.mrb[18].mxu0  ;;  %v515_v33 = vpop.f32.mrb[18].mxu1 }
  0xff   :  { %v615_v34 = vadd.f32 %v944_v6, %v579_v27  ;;  %v447_v35 = vmax.f32 %v306_v0, %v384_v32  ;;  %v582_v36 = vmax.f32 %v441_v17, %v515_v33  ;;  %v386_v37 = vpop.f32.mrb[19].mxu0  ;;  %v517_v38 = vpop.f32.mrb[19].mxu1 }
 0x100   :  { %v616_v39 = vadd.f32 %v944_v6, %v580_v31  ;;  %v448_v40 = vmax.f32 %v307_v4, %v386_v37  ;;  %v583_v41 = vmax.f32 %v442_v21, %v517_v38 }
 0x101   :  { %v627_v42 = vmax.f32 %v615_v34, 0.0  ;;  %v618_v43 = vadd.f32 %v603_v23, %v582_v36 }
 0x102   :  { %v628_v44 = vmax.f32 %v616_v39, 0.0  ;;  %v619_v45 = vadd.f32 %v603_v23, %v583_v41 }
 0x103   :  { %v630_v47 = vmax.f32 %v618_v43, 0.0 }
 0x104   :  { %v742_v48 = vpack.c.bf16 %v628_v44, %v627_v42  ;;  %v631_v49 = vmax.f32 %v619_v45, 0.0  ;;  %v521_v50 = vpop.f32.mrb[20].mxu1  ;;  %v784_v51 = vpop.f32.mrb[20].mxu0 }
 0x105   :  { %v585_v52 = vmax.f32 %v444_v26, %v521_v50  ;;  %v587_v53 = vmax.f32 %v446_v10, %v784_v51  ;;  %v523_v54 = vpop.f32.mrb[21].mxu1  ;;  %v564_v55 = vpop.f32.mrb[21].mxu0 }
 0x106   :  { %679 = vst [vmem:[%s980_s3] sm:$0xff] %v742_v48  ;;  %v744_v56 = vpack.c.bf16 %v631_v49, %v630_v47  ;;  %v586_v57 = vmax.f32 %v445_v30, %v523_v54  ;;  %v581_v58 = vmax.f32 %v440_v14, %v564_v55  ;;  %v525_v59 = vpop.f32.mrb[22].mxu1  ;;  %v785_v60 = vpop.f32.mrb[22].mxu0 }
 0x107   :  { %v621_v61 = vadd.f32 %v608_v46, %v585_v52  ;;  %v623_v62 = vadd.f32 %v608_v46, %v587_v53  ;;  %v588_v63 = vmax.f32 %v447_v35, %v525_v59  ;;  %v590_v0 = vmax.f32 %v449_v18, %v785_v60  ;;  %v527_v1 = vpop.f32.mrb[23].mxu1  ;;  %v567_v2 = vpop.f32.mrb[23].mxu0 }
 0x108   :  { %682 = vst [vmem:[%s980_s3 + $0xc] sm:$0xff] %v744_v56  ;;  %v622_v3 = vadd.f32 %v608_v46, %v586_v57  ;;  %v617_v4 = vadd.f32 %v944_v6, %v581_v58  ;;  %v589_v7 = vmax.f32 %v448_v40, %v527_v1  ;;  %v584_v8 = vmax.f32 %v443_v22, %v567_v2 }
 0x109   :  { %v633_v9 = vmax.f32 %v621_v61, 0.0  ;;  %v635_v10 = vmax.f32 %v623_v62, 0.0  ;;  %v624_v11 = vadd.f32 %v613_v5, %v588_v63  ;;  %v626_v12 = vadd.f32 %v613_v5, %v590_v0 }
 0x10a   :  { %v634_v13 = vmax.f32 %v622_v3, 0.0  ;;  %v629_v14 = vmax.f32 %v617_v4, 0.0  ;;  %v625_v15 = vadd.f32 %v613_v5, %v589_v7  ;;  %v620_v16 = vadd.f32 %v603_v23, %v584_v8 }
 0x10b   :  { %v747_v17 = vpack.c.bf16 %v635_v10, %v635_v10  ;;  %v636_v18 = vmax.f32 %v624_v11, 0.0  ;;  %v638_v19 = vmax.f32 %v626_v12, 0.0 }
 0x10c   :  { %v746_v20 = vpack.c.bf16 %v634_v13, %v633_v9  ;;  %v743_v21 = vpack.c.bf16 %v629_v14, %v629_v14  ;;  %v637_v24 = vmax.f32 %v625_v15, 0.0  ;;  %v632_v25 = vmax.f32 %v620_v16, 0.0 }
 0x10d   :  { %685 = vst.msk [vmem:[%s980_s3 + $0x20] sm:$0xf] %vm680_vm3, %v747_v17  ;;  %v749_v6 = vpack.c.bf16 %v638_v19, %v638_v19 }
 0x10e   :  { %684 = vst [vmem:[%s980_s3 + $0x18] sm:$0xff] %v746_v20  ;;  %681 = vst.msk [vmem:[%s980_s3 + $0x8] sm:$0xf] %vm680_vm3, %v743_v21  ;;  %v748_v22 = vpack.c.bf16 %v637_v24, %v636_v18  ;;  %v745_v23 = vpack.c.bf16 %v632_v25, %v632_v25 }
 0x10f   :  { %687 = vst.msk [vmem:[%s980_s3 + $0x2c] sm:$0xf] %vm680_vm3, %v749_v6 }
 0x110   :  { %686 = vst [vmem:[%s980_s3 + $0x24] sm:$0xff] %v748_v22  ;;  %683 = vst.msk [vmem:[%s980_s3 + $0x14] sm:$0xf] %vm680_vm3, %v745_v23 }

// kernel: mnist_forward.4
= control target key start
LH: loop header
LB: loop body
LE: loop exit
PB: predicated region body
PF: predicated region fallthrough
CT: control target
= control target key end

     0   :  { %vm228_vm0 = vcmask 261120   ;;  %vm1070_vm1 = vcmask 519168   ;;  %vm1077_vm2 = vcmask 516096   ;;  %s1933_s1 = inlined_call_operand.vmem [shape: bf16[288,64], index: 1, kind: input, shape index: {}]   ;;  %s1934_s0 = inlined_call_operand.vmem [shape: bf16[4,50,288], index: 0, kind: input, shape index: {}]   ;;  %s1935_s2 = inlined_call_operand.vmem [shape: f32[1,64], index: 2, kind: input, shape index: {}]   ;;  %s1936_s3 = inlined_call_operand.vmem [shape: bf16[50,64], index: 3, kind: output, shape index: {}]  }
   0x1   :  { %v1555_v0 = vld [vmem:[%s1933_s1 + $0x40] sm:$0xff]   ;;  %v1567_v2 = vld [vmem:[%s1933_s1 + $0x48] sm:$0xff]   ;;  %v1581_v4 = vld [vmem:[%s1933_s1 + $0x50] sm:$0xff]  }
   0x2   :  { %v1560_v1 = vld [vmem:[%s1933_s1] sm:$0xff]   ;;  %1222 = vmatprep.subr.bf16.mxu0 %v1555_v0  ;;  %1268 = vmatprep.subr.bf16.mxu1 %v1555_v0  ;;  %v1574_v3 = vld [vmem:[%s1933_s1 + $0x8] sm:$0xff]   ;;  %v1588_v5 = vld [vmem:[%s1933_s1 + $0x10] sm:$0xff]  }
   0x3   :  { %1223 = vmatpush3.bf16.msra.mxu0 %v1560_v1  ;;  %1269 = vmatpush3.bf16.msra.mxu1 %v1560_v1  ;;  %v1595_v6 = vld [vmem:[%s1933_s1 + $0x58] sm:$0xff]   ;;  %v1609_v8 = vld [vmem:[%s1933_s1 + $0x60] sm:$0xff]   ;;  %v1623_v10 = vld [vmem:[%s1933_s1 + $0x68] sm:$0xff]  }
   0x4   :  { %1224 = vmatprep.subr.bf16.mxu0 %v1567_v2  ;;  %1270 = vmatprep.subr.bf16.mxu1 %v1567_v2  ;;  %v1602_v7 = vld [vmem:[%s1933_s1 + $0x18] sm:$0xff]   ;;  %v1616_v9 = vld [vmem:[%s1933_s1 + $0x20] sm:$0xff]   ;;  %v1636_v13 = vld [vmem:[%s1933_s1 + $0x28] sm:$0xff]  }
   0x5   :  { %v1472_v11 = vld [vmem:[%s1934_s0 + $0x4] ss:$12 sps:$4 sm:$0xff]   ;;  %v1657_v16 = vld [vmem:[%s1933_s1 + $0x78] sm:$0xff]   ;;  %v1470_v19 = vld [vmem:[%s1934_s0] ss:$12 sps:$4 sm:$0xff]  }
   0x6   :  { %v1475_v12 = vld [vmem:[%s1934_s0 + $0x58] ss:$12 sps:$4 sm:$0xff]   ;;  %v1643_v14 = vld [vmem:[%s1933_s1 + $0x70] sm:$0xff]   ;;  %273 = vmatprep.mubr.bf16.mxu0 %v1472_v11  ;;  %v1477_v21 = vld [vmem:[%s1934_s0 + $0x1c] ss:$12 sps:$4 sm:$0xff]  }
   0x7   :  { %1225 = vmatpush3.bf16.msra.mxu0 %v1574_v3  ;;  %1271 = vmatpush3.bf16.msra.mxu1 %v1574_v3  ;;  %v1650_v15 = vld [vmem:[%s1933_s1 + $0x30] sm:$0xff]   ;;  %v1664_v17 = vld [vmem:[%s1933_s1 + $0x38] sm:$0xff]   ;;  %v1671_v18 = vld [vmem:[%s1933_s1 + $0x80] sm:$0xff]  }
   0x8   :  { %1226 = vmatprep.subr.bf16.mxu0 %v1581_v4  ;;  %1272 = vmatprep.subr.bf16.mxu1 %v1581_v4  ;;  %v1473_v20 = vld [vmem:[%s1934_s0 + $0x54] ss:$12 sps:$4 sm:$0xff]   ;;  %v1479_v22 = vld [vmem:[%s1934_s0 + $0x70] ss:$12 sps:$4 sm:$0xff]   ;;  %v1692_v23 = vld [vmem:[%s1933_s1 + $0x88] sm:$0xff]  }
   0x9   :  { %483 = vmatprep.mubr.bf16.mxu1 %v1475_v12  ;;  %v1481_v24 = vld [vmem:[%s1934_s0 + $0x18] ss:$12 sps:$4 sm:$0xff]   ;;  %v1483_v26 = vld [vmem:[%s1934_s0 + $0x34] ss:$12 sps:$4 sm:$0xff]   ;;  %v63_v28 = vld [vmem:[%s1934_s0 + $0x48] sm:$0x11] }
   0xa   :  { %v1482_v25 = vld [vmem:[%s1934_s0 + $0x6c] ss:$12 sps:$4 sm:$0xff]   ;;  %v1485_v27 = vld [vmem:[%s1934_s0 + $0x88] ss:$12 sps:$4 sm:$0xff]   ;;  %v1129_v29 = vld [vmem:[%s1934_s0 + $0x9c] sm:$0x11]  ;;  %v1093_v32 = vcombine.high %v63_v28, %v63_v28  ;;  %v1092_v34 = vcombine.low %v63_v28, %v63_v28 }
   0xb   :  { %1227 = vmatpush3.bf16.msra.mxu0 %v1588_v5  ;;  %1273 = vmatpush3.bf16.msra.mxu1 %v1588_v5  ;;  %v1487_v30 = vld [vmem:[%s1934_s0 + $0x30] ss:$12 sps:$4 sm:$0xff]   ;;  %v1141_v33 = vcombine.high %v1129_v29, %v1129_v29  ;;  %v1140_v35 = vcombine.low %v1129_v29, %v1129_v29  ;;  %v1494_v36 = vld [vmem:[%s1934_s0 + $0x8] ss:$12 sps:$4 sm:$0xff]   ;;  %v1497_v37 = vld [vmem:[%s1934_s0 + $0xac] ss:$12 sps:$4 sm:$0xff]  }
   0xc   :  { %1228 = vmatprep.subr.bf16.mxu0 %v1595_v6  ;;  %1274 = vmatprep.subr.bf16.mxu1 %v1595_v6  ;;  %v1489_v31 = vld [vmem:[%s1934_s0 + $0x84] ss:$12 sps:$4 sm:$0xff]   ;;  %v1495_v38 = vld [vmem:[%s1934_s0 + $0xa8] ss:$12 sps:$4 sm:$0xff]   ;;  %v1498_v39 = vld [vmem:[%s1934_s0 + $0x20] ss:$12 sps:$4 sm:$0xff]  }
   0xd   :  { %v1499_v40 = vld [vmem:[%s1934_s0 + $0x38] ss:$12 sps:$4 sm:$0xff]   ;;  %v1502_v42 = vld [vmem:[%s1934_s0 + $0x50] ss:$0 sps:$4 sm:$0x11]  }
   0xe   :  { %v1500_v41 = vld [vmem:[%s1934_s0 + $0xc4] ss:$12 sps:$4 sm:$0xff]   ;;  %v1503_v43 = vld [vmem:[%s1934_s0 + $0xc0] ss:$12 sps:$4 sm:$0xff]   ;;  %v1504_v44 = vld [vmem:[%s1934_s0 + $0x5c] ss:$12 sps:$4 sm:$0xff]  }
   0xf   :  { %1229 = vmatpush3.bf16.msra.mxu0 %v1602_v7  ;;  %1275 = vmatpush3.bf16.msra.mxu1 %v1602_v7  ;;  %v1505_v45 = vld [vmem:[%s1934_s0 + $0xdc] ss:$12 sps:$4 sm:$0xff]   ;;  %v1507_v46 = vld [vmem:[%s1934_s0 + $0x74] ss:$12 sps:$4 sm:$0xff]   ;;  %v1508_v47 = vld [vmem:[%s1934_s0 + $0xd8] ss:$12 sps:$4 sm:$0xff]  }
  0x10   :  { %1230 = vmatprep.subr.bf16.mxu0 %v1609_v8  ;;  %1276 = vmatprep.subr.bf16.mxu1 %v1609_v8  ;;  %v1159_v48 = vld [vmem:[%s1934_s0 + $0xf0] sm:$0x11]  ;;  %v1509_v49 = vld [vmem:[%s1934_s0 + $0x8c] ss:$12 sps:$4 sm:$0xff]   ;;  %v1514_v55 = vld [vmem:[%s1934_s0 + $0xfc] ss:$12 sps:$4 sm:$0xff]  }
  0x11   :  { %v1171_v50 = vcombine.high %v1159_v48, %v1159_v48  ;;  %v1511_v51 = vld [vmem:[%s1934_s0 + $0xa4] ss:$0 sps:$4 sm:$0x11]   ;;  %v1170_v52 = vcombine.low %v1159_v48, %v1159_v48  ;;  %v1513_v53 = vld [vmem:[%s1934_s0 + $0xb0] ss:$12 sps:$4 sm:$0xff]  }
  0x12   :  { %v1516_v54 = vld [vmem:[%s1934_s0 + $0x100] ss:$12 sps:$4 sm:$0xff]   ;;  %v1517_v56 = vld [vmem:[%s1934_s0 + $0xc8] ss:$12 sps:$4 sm:$0xff]   ;;  %v1519_v58 = vld [vmem:[%s1934_s0 + $0x118] ss:$12 sps:$4 sm:$0xff]  }
  0x13   :  { %1231 = vmatpush3.bf16.msra.mxu0 %v1616_v9  ;;  %1277 = vmatpush3.bf16.msra.mxu1 %v1616_v9  ;;  %v1518_v57 = vld [vmem:[%s1934_s0 + $0xe0] ss:$12 sps:$4 sm:$0xff]   ;;  %v1521_v59 = vld [vmem:[%s1934_s0 + $0xf8] ss:$0 sps:$4 sm:$0x11]  }
  0x14   :  { %1232 = vmatprep.subr.bf16.mxu0 %v1623_v10  ;;  %1278 = vmatprep.subr.bf16.mxu1 %v1623_v10  ;;  %v1522_v60 = vld [vmem:[%s1934_s0 + $0x114] ss:$12 sps:$4 sm:$0xff]   ;;  %v1523_v61 = vld [vmem:[%s1934_s0 + $0x130] ss:$12 sps:$4 sm:$0xff]   ;;  %v1189_v63 = vld [vmem:[%s1934_s0 + $0x144] sm:$0x11] }
  0x15   :  { %v1525_v62 = vld [vmem:[%s1934_s0 + $0x104] ss:$12 sps:$4 sm:$0xff]  }
  0x17   :  { %1233 = vmatpush3.bf16.msra.mxu0 %v1636_v13  ;;  %1279 = vmatpush3.bf16.msra.mxu1 %v1636_v13 }
  0x18   :  { %1234 = vmatprep.subr.bf16.mxu0 %v1643_v14  ;;  %1280 = vmatprep.subr.bf16.mxu1 %v1643_v14 }
  0x1b   :  { %1235 = vmatpush3.bf16.msra.mxu0 %v1650_v15  ;;  %1281 = vmatpush3.bf16.msra.mxu1 %v1650_v15 }
  0x1c   :  { %1236 = vmatprep.subr.bf16.mxu0 %v1657_v16  ;;  %1282 = vmatprep.subr.bf16.mxu1 %v1657_v16 }
  0x1f   :  { %1237 = vmatpush3.bf16.msra.mxu0 %v1664_v17  ;;  %1283 = vmatpush3.bf16.msra.mxu1 %v1664_v17 }
  0x20   :  { %1406 = vmatprep.subr.bf16.mxu0 %v1671_v18  ;;  %1314 = vmatprep.subr.bf16.mxu1 %v1555_v0 }
  0x22   :  { %274 = vmatmul.mubr.bf16.vlgmr.msra.gmra.mrb[0].mxu0 %v1470_v19  ;;  %484 = vmatmul.mubr.bf16.vlgmr.msra.gmra.mrb[0].mxu1 %v1473_v20 }
  0x23   :  { %1407 = vmatpush3.bf16.msra.mxu0 %v1671_v18  ;;  %1315 = vmatpush3.bf16.msra.mxu1 %v1560_v1 }
  0x24   :  { %1316 = vmatprep.subr.bf16.mxu1 %v1567_v2  ;;  %281 = vmatprep.mubr.bf16.mxu0 %v1477_v21 }
  0x25   :  { %491 = vmatprep.mubr.bf16.mxu1 %v1479_v22  ;;  %1408 = vmatprep.subr.bf16.mxu0 %v1692_v23 }
  0x27   :  { %1317 = vmatpush3.bf16.msra.mxu1 %v1574_v3  ;;  %1409 = vmatpush3.bf16.msra.mxu0 %v1692_v23 }
  0x28   :  { %1318 = vmatprep.subr.bf16.mxu1 %v1581_v4  ;;  %1418 = vmatprep.subr.bf16.mxu0 %v1671_v18 }
  0x2a   :  { %282 = vmatmul.mubr.bf16.gmra.mrb[4].mxu0 %v1481_v24  ;;  %492 = vmatmul.mubr.bf16.gmra.mrb[4].mxu1 %v1482_v25 }
  0x2b   :  { %1319 = vmatpush3.bf16.msra.mxu1 %v1588_v5  ;;  %289 = vmatprep.mubr.bf16.mxu0 %v1483_v26 }
  0x2c   :  { %1320 = vmatprep.subr.bf16.mxu1 %v1595_v6  ;;  %499 = vmatprep.mubr.bf16.mxu1 %v1485_v27 }
  0x2f   :  { %1321 = vmatpush3.bf16.msra.mxu1 %v1602_v7 }
  0x30   :  { %1322 = vmatprep.subr.bf16.mxu1 %v1609_v8 }
  0x32   :  { %290 = vmatmul.mubr.bf16.gmra.mrb[8].mxu0 %v1487_v30  ;;  %500 = vmatmul.mubr.bf16.gmra.mrb[8].mxu1 %v1489_v31 }
  0x33   :  { %1323 = vmatpush3.bf16.msra.mxu1 %v1616_v9  ;;  %297 = vmatprep.mubr.bf16.mxu0 %v1093_v32 }
  0x34   :  { %1324 = vmatprep.subr.bf16.mxu1 %v1623_v10  ;;  %507 = vmatprep.mubr.bf16.mxu1 %v1141_v33 }
  0x37   :  { %1325 = vmatpush3.bf16.msra.mxu1 %v1636_v13 }
  0x38   :  { %1326 = vmatprep.subr.bf16.mxu1 %v1643_v14 }
  0x3a   :  { %298 = vmatmul.mubr.bf16.gmra.mrb[12].mxu0 %v1092_v34  ;;  %508 = vmatmul.mubr.bf16.gmra.mrb[12].mxu1 %v1140_v35 }
  0x3b   :  { %1327 = vmatpush3.bf16.msra.mxu1 %v1650_v15  ;;  %1410 = vmatprep.mubr.msk.bf16.mxu0 %vm228_vm0, %v1494_v36 }
  0x3c   :  { %1328 = vmatprep.subr.bf16.mxu1 %v1657_v16  ;;  %700 = vmatprep.mubr.bf16.mxu1 %v1497_v37 }
  0x3f   :  { %1329 = vmatpush3.bf16.msra.mxu1 %v1664_v17 }
  0x40   :  { %1360 = vmatprep.subr.bf16.mxu1 %v1555_v0  ;;  %v1526_v0 = vld [vmem:[%s1934_s0 + $0x12c] ss:$12 sps:$4 sm:$0xff]  }
  0x42   :  { %1411 = vmatmul.mubr.msk.bf16.vlgmr.msra.gmra.mrb[16].mxu0 %vm228_vm0, %v1498_v39  ;;  %701 = vmatmul.mubr.bf16.vlgmr.msra.gmra.mrb[16].mxu1 %v1495_v38 }
  0x43   :  { %1419 = vmatpush3.bf16.msra.mxu0 %v1671_v18  ;;  %1361 = vmatpush3.bf16.msra.mxu1 %v1560_v1  ;;  %v1527_v1 = vld [vmem:[%s1934_s0 + $0x11c] ss:$12 sps:$4 sm:$0xff]  }
  0x44   :  { %1362 = vmatprep.subr.bf16.mxu1 %v1567_v2  ;;  %1414 = vmatprep.mubr.msk.bf16.mxu0 %vm228_vm0, %v1499_v40  ;;  %v1201_v2 = vcombine.high %v1189_v63, %v1189_v63 }
  0x45   :  { %708 = vmatprep.mubr.bf16.mxu1 %v1500_v41  ;;  %1420 = vmatprep.subr.bf16.mxu0 %v1692_v23 }
  0x47   :  { %1363 = vmatpush3.bf16.msra.mxu1 %v1574_v3  ;;  %1421 = vmatpush3.bf16.msra.mxu0 %v1692_v23  ;;  %v1529_v3 = vld [vmem:[%s1934_s0 + $0x134] ss:$12 sps:$4 sm:$0xff]  }
  0x48   :  { %1364 = vmatprep.subr.bf16.mxu1 %v1581_v4  ;;  %1430 = vmatprep.subr.bf16.mxu0 %v1671_v18  ;;  %v1200_v4 = vcombine.low %v1189_v63, %v1189_v63 }
  0x4a   :  { %1415 = vmatmul.mubr.msk.bf16.gmra.mrb[20].mxu0 %vm228_vm0, %v1502_v42  ;;  %709 = vmatmul.mubr.bf16.gmra.mrb[20].mxu1 %v1503_v43 }
  0x4b   :  { %1365 = vmatpush3.bf16.msra.mxu1 %v1588_v5  ;;  %1422 = vmatprep.mubr.msk.bf16.mxu0 %vm228_vm0, %v1504_v44  ;;  %v1531_v5 = vld [vmem:[%s1934_s0 + $0x14c] ss:$0 sps:$4 sm:$0x11]  }
  0x4c   :  { %1366 = vmatprep.subr.bf16.mxu1 %v1595_v6  ;;  %716 = vmatprep.mubr.bf16.mxu1 %v1505_v45 }
  0x4f   :  { %1367 = vmatpush3.bf16.msra.mxu1 %v1602_v7 }
  0x50   :  { %1368 = vmatprep.subr.bf16.mxu1 %v1609_v8 }
  0x52   :  { %1423 = vmatmul.mubr.msk.bf16.vlgmr.msra.gmra.mrb[24].mxu0 %vm228_vm0, %v1507_v46  ;;  %717 = vmatmul.mubr.bf16.gmra.mrb[24].mxu1 %v1508_v47 }
  0x53   :  { %1431 = vmatpush3.bf16.msra.mxu0 %v1671_v18  ;;  %1369 = vmatpush3.bf16.msra.mxu1 %v1616_v9 }
  0x54   :  { %1370 = vmatprep.subr.bf16.mxu1 %v1623_v10  ;;  %1426 = vmatprep.mubr.msk.bf16.mxu0 %vm228_vm0, %v1509_v49 }
  0x55   :  { %724 = vmatprep.mubr.bf16.mxu1 %v1171_v50  ;;  %1432 = vmatprep.subr.bf16.mxu0 %v1692_v23 }
  0x57   :  { %1371 = vmatpush3.bf16.msra.mxu1 %v1636_v13  ;;  %1433 = vmatpush3.bf16.msra.mxu0 %v1692_v23 }
  0x58   :  { %1372 = vmatprep.subr.bf16.mxu1 %v1643_v14  ;;  %1442 = vmatprep.subr.bf16.mxu0 %v1671_v18 }
  0x5a   :  { %1427 = vmatmul.mubr.msk.bf16.gmra.mrb[28].mxu0 %vm228_vm0, %v1511_v51  ;;  %725 = vmatmul.mubr.bf16.gmra.mrb[28].mxu1 %v1170_v52 }
  0x5b   :  { %1373 = vmatpush3.bf16.msra.mxu1 %v1650_v15  ;;  %1434 = vmatprep.mubr.msk.bf16.mxu0 %vm228_vm0, %v1513_v53 }
  0x5c   :  { %1374 = vmatprep.subr.bf16.mxu1 %v1657_v16  ;;  %917 = vmatprep.mubr.bf16.mxu1 %v1516_v54 }
  0x5f   :  { %1375 = vmatpush3.bf16.msra.mxu1 %v1664_v17 }
  0x62   :  { %1435 = vmatmul.mubr.msk.bf16.vlgmr.msra.gmra.mrb[32].mxu0 %vm228_vm0, %v1517_v56  ;;  %918 = vmatmul.mubr.bf16.vlgmr.msra.gmra.mrb[32].mxu1 %v1514_v55 }
  0x63   :  { %1443 = vmatpush3.bf16.msra.mxu0 %v1671_v18  ;;  %1438 = vmatprep.mubr.msk.bf16.mxu0 %vm228_vm0, %v1518_v57 }
  0x64   :  { %925 = vmatprep.mubr.bf16.mxu1 %v1519_v58  ;;  %1444 = vmatprep.subr.bf16.mxu0 %v1692_v23 }
  0x67   :  { %1445 = vmatpush3.bf16.msra.mxu0 %v1692_v23 }
  0x6a   :  { %1439 = vmatmul.mubr.msk.bf16.gmra.mrb[36].mxu0 %vm228_vm0, %v1521_v59  ;;  %926 = vmatmul.mubr.bf16.gmra.mrb[36].mxu1 %v1522_v60 }
  0x6b   :  { %933 = vmatprep.mubr.bf16.mxu1 %v1523_v61  ;;  %1446 = vmatprep.mubr.msk.bf16.mxu0 %vm228_vm0, %v1525_v62 }
  0x72   :  { %934 = vmatmul.mubr.bf16.gmra.mrb[40].mxu1 %v1526_v0  ;;  %1447 = vmatmul.mubr.msk.bf16.vlgmr.msra.gmra.mrb[40].mxu0 %vm228_vm0, %v1527_v1 }
  0x73   :  { %941 = vmatprep.mubr.bf16.mxu1 %v1201_v2  ;;  %1450 = vmatprep.mubr.msk.bf16.mxu0 %vm228_vm0, %v1529_v3 }
  0x7a   :  { %942 = vmatmul.mubr.bf16.gmra.mrb[44].mxu1 %v1200_v4  ;;  %1451 = vmatmul.mubr.msk.bf16.gmra.mrb[44].mxu0 %vm228_vm0, %v1531_v5 }
  0xf5   :  { %v1238_v6 = vpop.f32.mrb[0].mxu0  ;;  %v1284_v7 = vpop.f32.mrb[0].mxu1 }
  0xf6   :  { %v1239_v8 = vpop.f32.mrb[1].mxu0  ;;  %v1285_v9 = vpop.f32.mrb[1].mxu1 }
  0xf7   :  { %v1240_v10 = vadd.f32 %v1239_v8, %v1238_v6  ;;  %v1870_v11 = vadd.f32 %v1285_v9, %v1284_v7  ;;  %v1241_v12 = vpop.f32.mrb[2].mxu0  ;;  %v1287_v13 = vpop.f32.mrb[2].mxu1 }
  0xf8   :  { %v1242_v14 = vpop.f32.mrb[3].mxu0  ;;  %v1288_v15 = vpop.f32.mrb[3].mxu1 }
  0xf9   :  { %v1243_v16 = vadd.f32 %v1242_v14, %v1241_v12  ;;  %v1872_v17 = vadd.f32 %v1288_v15, %v1287_v13 }
  0xfd   :  { %v1244_v18 = vpop.f32.mrb[4].mxu0  ;;  %v1290_v19 = vpop.f32.mrb[4].mxu1 }
  0xfe   :  { %v1245_v20 = vpop.f32.mrb[5].mxu0  ;;  %v1291_v21 = vpop.f32.mrb[5].mxu1 }
  0xff   :  { %v1246_v22 = vadd.f32 %v1245_v20, %v1244_v18  ;;  %v1292_v23 = vadd.f32 %v1291_v21, %v1290_v19  ;;  %v1247_v24 = vpop.f32.mrb[6].mxu0  ;;  %v1293_v25 = vpop.f32.mrb[6].mxu1 }
 0x100   :  { %v1248_v26 = vpop.f32.mrb[7].mxu0  ;;  %v1294_v27 = vpop.f32.mrb[7].mxu1 }
 0x101   :  { %v1249_v28 = vadd.f32 %v1248_v26, %v1247_v24  ;;  %v1295_v29 = vadd.f32 %v1294_v27, %v1293_v25 }
 0x105   :  { %v1250_v30 = vpop.f32.mrb[8].mxu0  ;;  %v1296_v31 = vpop.f32.mrb[8].mxu1 }
 0x106   :  { %v1251_v32 = vpop.f32.mrb[9].mxu0  ;;  %v1297_v33 = vpop.f32.mrb[9].mxu1 }
 0x107   :  { %v1252_v34 = vadd.f32 %v1251_v32, %v1250_v30  ;;  %v1874_v35 = vadd.f32 %v1297_v33, %v1296_v31  ;;  %v1253_v36 = vpop.f32.mrb[10].mxu0  ;;  %v1299_v37 = vpop.f32.mrb[10].mxu1 }
 0x108   :  { %v1254_v38 = vpop.f32.mrb[11].mxu0  ;;  %v1300_v39 = vpop.f32.mrb[11].mxu1 }
 0x109   :  { %v1255_v40 = vadd.f32 %v1254_v38, %v1253_v36  ;;  %v1876_v41 = vadd.f32 %v1300_v39, %v1299_v37 }
 0x10d   :  { %v1256_v42 = vpop.f32.mrb[12].mxu0  ;;  %v1302_v43 = vpop.f32.mrb[12].mxu1 }
 0x10e   :  { %v1257_v44 = vpop.f32.mrb[13].mxu0  ;;  %v1303_v45 = vpop.f32.mrb[13].mxu1 }
 0x10f   :  { %v1258_v46 = vadd.f32 %v1257_v44, %v1256_v42  ;;  %v1304_v47 = vadd.f32 %v1303_v45, %v1302_v43  ;;  %v1259_v48 = vpop.f32.mrb[14].mxu0  ;;  %v1305_v49 = vpop.f32.mrb[14].mxu1 }
 0x110   :  { %v1260_v50 = vpop.f32.mrb[15].mxu0  ;;  %v1306_v51 = vpop.f32.mrb[15].mxu1 }
 0x115   :  { %v1412_v52 = vpop.f32.mrb[16].mxu0  ;;  %v1330_v53 = vpop.f32.mrb[16].mxu1 }
 0x116   :  { %v1878_v54 = vadd.f32 %v1412_v52, %v1246_v22  ;;  %v339_v55 = vpop.f32.mrb[17].mxu0  ;;  %v1331_v56 = vpop.f32.mrb[17].mxu1 }
 0x117   :  { %v1880_v57 = vadd.f32 %v1240_v10, %v339_v55  ;;  %v1332_v58 = vadd.f32 %v1331_v56, %v1330_v53  ;;  %v1413_v59 = vpop.f32.mrb[18].mxu0  ;;  %v1333_v60 = vpop.f32.mrb[18].mxu1 }
 0x118   :  { %v1882_v61 = vadd.f32 %v1413_v59, %v1249_v28  ;;  %v342_v62 = vpop.f32.mrb[19].mxu0  ;;  %v1334_v63 = vpop.f32.mrb[19].mxu1 }
 0x119   :  { %v1884_v0 = vadd.f32 %v1243_v16, %v342_v62  ;;  %v1335_v1 = vadd.f32 %v1334_v63, %v1333_v60 }
 0x11d   :  { %v1416_v2 = vpop.f32.mrb[20].mxu0  ;;  %v1336_v3 = vpop.f32.mrb[20].mxu1 }
 0x11e   :  { %v1886_v4 = vadd.f32 %v1416_v2, %v1258_v46  ;;  %v355_v5 = vpop.f32.mrb[21].mxu0  ;;  %v1337_v6 = vpop.f32.mrb[21].mxu1 }
 0x11f   :  { %v1888_v7 = vadd.f32 %v1252_v34, %v355_v5  ;;  %v1338_v8 = vadd.f32 %v1337_v6, %v1336_v3  ;;  %v1417_v9 = vpop.f32.mrb[22].mxu0  ;;  %v1339_v10 = vpop.f32.mrb[22].mxu1 }
 0x120   :  { %v358_v12 = vpop.f32.mrb[23].mxu0  ;;  %v1340_v13 = vpop.f32.mrb[23].mxu1 }
 0x121   :  { %v1890_v14 = vadd.f32 %v1255_v40, %v358_v12  ;;  %v1341_v15 = vadd.f32 %v1340_v13, %v1339_v10 }
 0x125   :  { %v1424_v18 = vpop.f32.mrb[24].mxu0  ;;  %v1342_v16 = vpop.f32.mrb[24].mxu1 }
 0x126   :  { %v558_v19 = vadd.f32 %v1424_v18, %v1292_v23  ;;  %v549_v20 = vpop.f32.mrb[25].mxu0  ;;  %v1343_v21 = vpop.f32.mrb[25].mxu1 }
 0x127   :  { %v550_v22 = vadd.f32 %v1870_v11, %v549_v20  ;;  %v1344_v24 = vadd.f32 %v1343_v21, %v1342_v16  ;;  %v1425_v25 = vpop.f32.mrb[26].mxu0  ;;  %v1345_v26 = vpop.f32.mrb[26].mxu1 }
 0x128   :  { %v581_v27 = vmax.f32 %v1878_v54, %v558_v19  ;;  %v561_v28 = vadd.f32 %v1425_v25, %v1295_v29  ;;  %v552_v30 = vpop.f32.mrb[27].mxu0  ;;  %v1346_v31 = vpop.f32.mrb[27].mxu1 }
 0x129   :  { %v579_v32 = vmax.f32 %v1880_v57, %v550_v22  ;;  %v553_v33 = vadd.f32 %v1872_v17, %v552_v30  ;;  %v1347_v34 = vadd.f32 %v1346_v31, %v1345_v26 }
 0x12a   :  { %v582_v36 = vmax.f32 %v1882_v61, %v561_v28 }
 0x12b   :  { %v580_v23 = vmax.f32 %v1884_v0, %v553_v33 }
 0x12d   :  { %v1428_v37 = vpop.f32.mrb[28].mxu0  ;;  %v1348_v38 = vpop.f32.mrb[28].mxu1 }
 0x12e   :  { %v574_v11 = vadd.f32 %v1428_v37, %v1304_v47  ;;  %v565_v39 = vpop.f32.mrb[29].mxu0  ;;  %v1349_v40 = vpop.f32.mrb[29].mxu1 }
 0x12f   :  { %v566_v42 = vadd.f32 %v1874_v35, %v565_v39  ;;  %v1350_v43 = vadd.f32 %v1349_v40, %v1348_v38  ;;  %v1429_v29 = vpop.f32.mrb[30].mxu0  ;;  %v1351_v44 = vpop.f32.mrb[30].mxu1 }
 0x130   :  { %v585_v45 = vmax.f32 %v1886_v4, %v574_v11  ;;  %v568_v46 = vpop.f32.mrb[31].mxu0  ;;  %v1352_v48 = vpop.f32.mrb[31].mxu1 }
 0x131   :  { %v583_v17 = vmax.f32 %v1888_v7, %v566_v42  ;;  %v569_v49 = vadd.f32 %v1876_v41, %v568_v46 }
 0x133   :  { %v584_v50 = vmax.f32 %v1890_v14, %v569_v49 }
 0x135   :  { %v1436_v51 = vpop.f32.mrb[32].mxu0  ;;  %v1376_v52 = vpop.f32.mrb[32].mxu1 }
 0x136   :  { %v775_v47 = vadd.f32 %v1436_v51, %v1338_v8  ;;  %v766_v53 = vpop.f32.mrb[33].mxu0  ;;  %v1377_v54 = vpop.f32.mrb[33].mxu1 }
 0x137   :  { %v767_v55 = vadd.f32 %v1332_v58, %v766_v53  ;;  %v1378_v35 = vadd.f32 %v1377_v54, %v1376_v52  ;;  %v1437_v56 = vpop.f32.mrb[34].mxu0  ;;  %v1379_v57 = vpop.f32.mrb[34].mxu1 }
 0x138   :  { %v798_v59 = vmax.f32 %v581_v27, %v775_v47  ;;  %v778_v60 = vadd.f32 %v1437_v56, %v1341_v15  ;;  %v769_v61 = vpop.f32.mrb[35].mxu0  ;;  %v1380_v62 = vpop.f32.mrb[35].mxu1  ;;  %v1207_v27 = vld [vmem:[%s1935_s2] ss:$0 sm:$0xff] }
 0x139   :  { %v796_v63 = vmax.f32 %v579_v32, %v767_v55  ;;  %v770_v0 = vadd.f32 %v1335_v1, %v769_v61  ;;  %v1381_v2 = vadd.f32 %v1380_v62, %v1379_v57 }
 0x13a   :  { %v799_v3 = vmax.f32 %v582_v36, %v778_v60 }
 0x13b   :  { %v797_v41 = vmax.f32 %v580_v23, %v770_v0 }
 0x13d   :  { %v1440_v4 = vpop.f32.mrb[36].mxu0  ;;  %v1382_v5 = vpop.f32.mrb[36].mxu1 }
 0x13e   :  { %v791_v6 = vadd.f32 %v1440_v4, %v1350_v43  ;;  %v782_v7 = vpop.f32.mrb[37].mxu0  ;;  %v1383_v8 = vpop.f32.mrb[37].mxu1 }
 0x13f   :  { %v783_v9 = vadd.f32 %v1344_v24, %v782_v7  ;;  %v1384_v10 = vadd.f32 %v1383_v8, %v1382_v5  ;;  %v1441_v58 = vpop.f32.mrb[38].mxu0  ;;  %v1385_v12 = vpop.f32.mrb[38].mxu1 }
 0x140   :  { %v802_v13 = vmax.f32 %v585_v45, %v791_v6  ;;  %v785_v14 = vpop.f32.mrb[39].mxu0  ;;  %v1386_v18 = vpop.f32.mrb[39].mxu1 }
 0x141   :  { %v800_v15 = vmax.f32 %v583_v17, %v783_v9  ;;  %v786_v16 = vadd.f32 %v1347_v34, %v785_v14  ;;  %v1387_v19 = vadd.f32 %v1386_v18, %v1385_v12 }
 0x143   :  { %v801_v20 = vmax.f32 %v584_v50, %v786_v16 }
 0x145   :  { %v1388_v1 = vpop.f32.mrb[40].mxu1  ;;  %v1448_v21 = vpop.f32.mrb[40].mxu0 }
 0x146   :  { %v992_v22 = vadd.f32 %v1448_v21, %v1384_v10  ;;  %v1389_v25 = vpop.f32.mrb[41].mxu1  ;;  %v983_v26 = vpop.f32.mrb[41].mxu0 }
 0x147   :  { %v1390_v24 = vadd.f32 %v1389_v25, %v1388_v1  ;;  %v984_v28 = vadd.f32 %v1378_v35, %v983_v26  ;;  %v1391_v30 = vpop.f32.mrb[42].mxu1  ;;  %v1449_v31 = vpop.f32.mrb[42].mxu0 }
 0x148   :  { %v1015_v32 = vmax.f32 %v798_v59, %v992_v22  ;;  %v995_v33 = vadd.f32 %v1449_v31, %v1387_v19  ;;  %v1392_v36 = vpop.f32.mrb[43].mxu1  ;;  %v986_v23 = vpop.f32.mrb[43].mxu0 }
 0x149   :  { %v1013_v34 = vmax.f32 %v796_v63, %v984_v28  ;;  %v1393_v37 = vadd.f32 %v1392_v36, %v1391_v30  ;;  %v987_v38 = vadd.f32 %v1381_v2, %v986_v23 }
 0x14a   :  { %v1029_v11 = vadd.f32 %v1207_v27, %v1015_v32  ;;  %v1016_v39 = vmax.f32 %v799_v3, %v995_v33 }
 0x14b   :  { %v1027_v40 = vadd.f32 %v1207_v27, %v1013_v34  ;;  %v1014_v42 = vmax.f32 %v797_v41, %v987_v38 }
 0x14c   :  { %v1036_v43 = vmax.f32 %v1029_v11, 0.0  ;;  %v1030_v29 = vadd.f32 %v1207_v27, %v1016_v39 }
 0x14d   :  { %v1034_v44 = vmax.f32 %v1027_v40, 0.0  ;;  %v1028_v45 = vadd.f32 %v1207_v27, %v1014_v42  ;;  %v1394_v46 = vpop.f32.mrb[44].mxu1  ;;  %v1452_v48 = vpop.f32.mrb[44].mxu0 }
 0x14e   :  { %v1217_v17 = vpack.c.bf16 %v1036_v43, %v1036_v43  ;;  %v1037_v49 = vmax.f32 %v1030_v29, 0.0  ;;  %v1395_v50 = vpop.f32.mrb[45].mxu1  ;;  %v999_v51 = vpop.f32.mrb[45].mxu0 }
 0x14f   :  { %v1215_v52 = vpack.c.bf16 %v1034_v44, %v1034_v44  ;;  %v1035_v47 = vmax.f32 %v1028_v45, 0.0  ;;  %v1396_v53 = vadd.f32 %v1395_v50, %v1394_v46  ;;  %v1000_v54 = vadd.f32 %v1390_v24, %v999_v51  ;;  %v1397_v55 = vpop.f32.mrb[46].mxu1  ;;  %v1453_v35 = vpop.f32.mrb[46].mxu0 }
 0x150   :  { %1073 = vst.msk [vmem:[%s1936_s3 + $0x8] sm:$0xf] %vm1070_vm1, %v1217_v17  ;;  %v1218_v56 = vpack.c.bf16 %v1037_v49, %v1037_v49  ;;  %v1398_v57 = vpop.f32.mrb[47].mxu1  ;;  %v1002_v59 = vpop.f32.mrb[47].mxu0 }
 0x151   :  { %1071 = vst.msk [vmem:[%s1936_s3] sm:$0xf] %vm1070_vm1, %v1215_v52  ;;  %v1216_v60 = vpack.c.bf16 %v1035_v47, %v1035_v47  ;;  %v1008_v61 = vadd.f32 %v1452_v48, %v1396_v53  ;;  %v1017_v62 = vmax.f32 %v800_v15, %v1000_v54  ;;  %v1003_v63 = vadd.f32 %v1393_v37, %v1002_v59 }
 0x152   :  { %1074 = vst.msk [vmem:[%s1936_s3 + $0xc] sm:$0xf] %vm1070_vm1, %v1218_v56 }
 0x153   :  { %1072 = vst.msk [vmem:[%s1936_s3 + $0x4] sm:$0xf] %vm1070_vm1, %v1216_v60  ;;  %v1019_v0 = vmax.f32 %v802_v13, %v1008_v61  ;;  %v1031_v2 = vadd.f32 %v1207_v27, %v1017_v62  ;;  %v1018_v3 = vmax.f32 %v801_v20, %v1003_v63 }
 0x155   :  { %v1033_v41 = vadd.f32 %v1207_v27, %v1019_v0  ;;  %v1038_v4 = vmax.f32 %v1031_v2, 0.0  ;;  %v1032_v5 = vadd.f32 %v1207_v27, %v1018_v3 }
 0x157   :  { %v1040_v6 = vmax.f32 %v1033_v41, 0.0  ;;  %v1219_v7 = vpack.c.bf16 %v1038_v4, %v1038_v4  ;;  %v1039_v8 = vmax.f32 %v1032_v5, 0.0 }
 0x159   :  { %v1221_v9 = vpack.c.bf16 %v1040_v6, %v1040_v6  ;;  %1075 = vst.msk [vmem:[%s1936_s3 + $0x10] sm:$0xf] %vm1070_vm1, %v1219_v7  ;;  %v1220_v10 = vpack.c.bf16 %v1039_v8, %v1039_v8 }
 0x15b   :  { %1078 = vst.msk [vmem:[%s1936_s3 + $0x18] sm:$0x1] %vm1077_vm2, %v1221_v9 }
 0x15c   :  { %1076 = vst.msk [vmem:[%s1936_s3 + $0x14] sm:$0xf] %vm1070_vm1, %v1220_v10 }

// kernel: mnist_forward.5
= control target key start
LH: loop header
LB: loop body
LE: loop exit
PB: predicated region body
PF: predicated region fallthrough
CT: control target
= control target key end

     0   :  { %v237_v27 = vlaneseq  ;;  %v1772_v35 = vmov 1966171168   ;;  %s2172_s0 = inlined_call_operand.vmem [shape: bf16[2,1600], index: 0, kind: input, shape index: {}]   ;;  %s2173_s1 = inlined_call_operand.vmem [shape: bf16[1600,128], index: 1, kind: input, shape index: {}]   ;;  %s2174_s2 = inlined_call_operand.vmem [shape: f32[1,128], index: 2, kind: input, shape index: {}]   ;;  %s2175_s3 = inlined_call_operand.vmem [shape: bf16[128,128], index: 3, kind: input, shape index: {}]   ;;  %s2176_s4 = inlined_call_operand.vmem [shape: f32[1,128], index: 4, kind: input, shape index: {}]   ;;  %s2177_s5 = inlined_call_operand.hbm [shape: f32[2,128], index: 5, kind: output, shape index: {}]  }
   0x1   :  { %v1638_v0 = vld [vmem:[%s2173_s1 + $0x40] sm:$0xff]   ;;  %v1642_v4 = vld [vmem:[%s2173_s1 + $0x48] sm:$0xff]   ;;  %v1646_v8 = vld [vmem:[%s2173_s1 + $0x50] sm:$0xff]   ;;  %v235_v36 = vunpack.c.l.s4 %v1772_v35 }
   0x2   :  { %v1639_v1 = vld [vmem:[%s2173_s1] sm:$0xff]   ;;  %1456 = vmatprep.subr.bf16.mxu0 %v1638_v0  ;;  %v1643_v5 = vld [vmem:[%s2173_s1 + $0x8] sm:$0xff]   ;;  %v1647_v9 = vld [vmem:[%s2173_s1 + $0x10] sm:$0xff]   ;;  %v238_v32 = vshrl.u32 %v237_v27, 7 }
   0x3   :  { %v1640_v2 = vld [vmem:[%s2173_s1 + $0xc0] sm:$0xff]   ;;  %1457 = vmatpush3.bf16.msra.mxu0 %v1639_v1  ;;  %v1644_v6 = vld [vmem:[%s2173_s1 + $0xc8] sm:$0xff]   ;;  %v1648_v10 = vld [vmem:[%s2173_s1 + $0xd0] sm:$0xff]   ;;  %v236_v39 = vunpack.c.0.s8 %v235_v36 }
   0x4   :  { %v1641_v3 = vld [vmem:[%s2173_s1 + $0x80] sm:$0xff]   ;;  %1478 = vmatprep.subr.bf16.mxu1 %v1640_v2  ;;  %1458 = vmatprep.subr.bf16.mxu0 %v1642_v4  ;;  %v1645_v7 = vld [vmem:[%s2173_s1 + $0x88] sm:$0xff]   ;;  %v1649_v11 = vld [vmem:[%s2173_s1 + $0x90] sm:$0xff]  }
   0x5   :  { %1479 = vmatpush3.bf16.msra.mxu1 %v1641_v3  ;;  %v1650_v12 = vld [vmem:[%s2173_s1 + $0x58] sm:$0xff]   ;;  %v1654_v16 = vld [vmem:[%s2173_s1 + $0x60] sm:$0xff]   ;;  %v1658_v20 = vld [vmem:[%s2173_s1 + $0x68] sm:$0xff]   ;;  %v1911_v41 = vsub.s32 %v236_v39, %v238_v32 }
   0x6   :  { %1480 = vmatprep.subr.bf16.mxu1 %v1644_v6  ;;  %v1651_v13 = vld [vmem:[%s2173_s1 + $0x18] sm:$0xff]   ;;  %v1655_v17 = vld [vmem:[%s2173_s1 + $0x20] sm:$0xff]   ;;  %v1659_v21 = vld [vmem:[%s2173_s1 + $0x28] sm:$0xff]  }
   0x7   :  { %1459 = vmatpush3.bf16.msra.mxu0 %v1643_v5  ;;  %v1652_v14 = vld [vmem:[%s2173_s1 + $0xd8] sm:$0xff]   ;;  %v1656_v18 = vld [vmem:[%s2173_s1 + $0xe0] sm:$0xff]   ;;  %v1660_v22 = vld [vmem:[%s2173_s1 + $0xe8] sm:$0xff]  }
   0x8   :  { %1460 = vmatprep.subr.bf16.mxu0 %v1646_v8  ;;  %v1653_v15 = vld [vmem:[%s2173_s1 + $0x98] sm:$0xff]   ;;  %v1657_v19 = vld [vmem:[%s2173_s1 + $0xa0] sm:$0xff]   ;;  %v1661_v23 = vld [vmem:[%s2173_s1 + $0xa8] sm:$0xff]  }
   0x9   :  { %1481 = vmatpush3.bf16.msra.mxu1 %v1645_v7  ;;  %v1662_v24 = vld [vmem:[%s2173_s1 + $0x70] sm:$0xff]   ;;  %v1666_v29 = vld [vmem:[%s2173_s1 + $0x78] sm:$0xff]   ;;  %v22_v33 = vld [vmem:[%s2172_s0] sm:$0xff] }
   0xa   :  { %1482 = vmatprep.subr.bf16.mxu1 %v1648_v10  ;;  %v1663_v25 = vld [vmem:[%s2173_s1 + $0x30] sm:$0xff]   ;;  %v1667_v30 = vld [vmem:[%s2173_s1 + $0x38] sm:$0xff]   ;;  %v1671_v37 = vld [vmem:[%s2173_s1 + $0x140] sm:$0xff]   ;;  %v233_v38 = vcombine.high %v22_v33, %v22_v33  ;;  %v240_v42 = vrot.slane %v22_v33, %v1911_v41 }
   0xb   :  { %1461 = vmatpush3.bf16.msra.mxu0 %v1647_v9  ;;  %v1664_v26 = vld [vmem:[%s2173_s1 + $0xf0] sm:$0xff]   ;;  %v1668_v31 = vld [vmem:[%s2173_s1 + $0xf8] sm:$0xff]   ;;  %v1673_v40 = vld [vmem:[%s2173_s1 + $0x1c0] sm:$0xff]  }
   0xc   :  { %1462 = vmatprep.subr.bf16.mxu0 %v1650_v12  ;;  %v1665_v28 = vld [vmem:[%s2173_s1 + $0xb0] sm:$0xff]   ;;  %v1670_v34 = vld [vmem:[%s2173_s1 + $0xb8] sm:$0xff]   ;;  %v1915_v43 = vrot.slane %v233_v38, %v1911_v41  ;;  %v248_v44 = vcombine.high %v240_v42, %v240_v42  ;;  %v256_v45 = vrot.slane %v240_v42, %v1911_v41  ;;  %v1672_v47 = vld [vmem:[%s2173_s1 + $0x100] sm:$0xff]  }
   0xd   :  { %1483 = vmatpush3.bf16.msra.mxu1 %v1649_v11  ;;  %v1674_v49 = vld [vmem:[%s2173_s1 + $0x180] sm:$0xff]   ;;  %v1675_v52 = vld [vmem:[%s2173_s1 + $0x148] sm:$0xff]   ;;  %v1679_v58 = vld [vmem:[%s2173_s1 + $0x150] sm:$0xff]  }
   0xe   :  { %1484 = vmatprep.subr.bf16.mxu1 %v1652_v14  ;;  %v249_v46 = vcombine.high %v1915_v43, %v1915_v43  ;;  %v270_v48 = vrot.slane %v248_v44, %v1911_v41  ;;  %v278_v51 = vcombine.high %v256_v45, %v256_v45  ;;  %v1676_v54 = vld [vmem:[%s2173_s1 + $0x108] sm:$0xff]   ;;  %v1680_v59 = vld [vmem:[%s2173_s1 + $0x110] sm:$0xff]   ;;  %v1683_v62 = vld [vmem:[%s2173_s1 + $0x158] sm:$0xff]  }
   0xf   :  { %1463 = vmatpush3.bf16.msra.mxu0 %v1651_v13  ;;  %v1677_v55 = vld [vmem:[%s2173_s1 + $0x1c8] sm:$0xff]   ;;  %v1681_v60 = vld [vmem:[%s2173_s1 + $0x1d0] sm:$0xff]   ;;  %v1684_v63 = vld [vmem:[%s2173_s1 + $0x118] sm:$0xff]  }
  0x10   :  { %1464 = vmatprep.subr.bf16.mxu0 %v1654_v16  ;;  %v277_v50 = vrot.slane %v249_v46, %v1911_v41  ;;  %969 = vmatprep.mubr.bf16.mxu0 %v270_v48  ;;  %v280_v53 = vcombine.high %v270_v48, %v270_v48  ;;  %v1678_v57 = vld [vmem:[%s2173_s1 + $0x188] sm:$0xff]   ;;  %v1682_v61 = vld [vmem:[%s2173_s1 + $0x190] sm:$0xff]   ;;  %v1685_v0 = vld [vmem:[%s2173_s1 + $0x1d8] sm:$0xff]  }
  0x11   :  { %1485 = vmatpush3.bf16.msra.mxu1 %v1653_v15  ;;  %v1686_v1 = vld [vmem:[%s2173_s1 + $0x198] sm:$0xff]   ;;  %v1687_v2 = vld [vmem:[%s2173_s1 + $0x160] sm:$0xff]   ;;  %v1691_v6 = vld [vmem:[%s2173_s1 + $0x168] sm:$0xff]  }
  0x12   :  { %1486 = vmatprep.subr.bf16.mxu1 %v1656_v18  ;;  %v281_v56 = vcombine.high %v277_v50, %v277_v50  ;;  %1009 = vmatprep.mubr.bf16.mxu1 %v280_v53  ;;  %v1688_v3 = vld [vmem:[%s2173_s1 + $0x120] sm:$0xff]   ;;  %v1692_v7 = vld [vmem:[%s2173_s1 + $0x128] sm:$0xff]   ;;  %v1695_v10 = vld [vmem:[%s2173_s1 + $0x170] sm:$0xff]   ;;  %v263_v18 = vrot.slane %v1915_v43, %v1911_v41 }
  0x13   :  { %1465 = vmatpush3.bf16.msra.mxu0 %v1655_v17  ;;  %v1689_v4 = vld [vmem:[%s2173_s1 + $0x1e0] sm:$0xff]   ;;  %v1693_v8 = vld [vmem:[%s2173_s1 + $0x1e8] sm:$0xff]   ;;  %v1696_v11 = vld [vmem:[%s2173_s1 + $0x130] sm:$0xff]  }
  0x14   :  { %1466 = vmatprep.subr.bf16.mxu0 %v1658_v20  ;;  %v1690_v5 = vld [vmem:[%s2173_s1 + $0x1a0] sm:$0xff]   ;;  %v1694_v9 = vld [vmem:[%s2173_s1 + $0x1a8] sm:$0xff]   ;;  %v1697_v12 = vld [vmem:[%s2173_s1 + $0x1f0] sm:$0xff]  }
  0x15   :  { %1487 = vmatpush3.bf16.msra.mxu1 %v1657_v19  ;;  %v1698_v13 = vld [vmem:[%s2173_s1 + $0x1b0] sm:$0xff]   ;;  %v1699_v14 = vld [vmem:[%s2173_s1 + $0x178] sm:$0xff]   ;;  %v1703_v19 = vld [vmem:[%s2173_s1 + $0x240] sm:$0xff]  }
  0x16   :  { %1488 = vmatprep.subr.bf16.mxu1 %v1660_v22  ;;  %v1700_v15 = vld [vmem:[%s2173_s1 + $0x138] sm:$0xff]   ;;  %v1704_v20 = vld [vmem:[%s2173_s1 + $0x200] sm:$0xff]   ;;  %v1710_v27 = vld [vmem:[%s2173_s1 + $0x288] sm:$0xff]  }
  0x17   :  { %1467 = vmatpush3.bf16.msra.mxu0 %v1659_v21  ;;  %v1701_v16 = vld [vmem:[%s2173_s1 + $0x1f8] sm:$0xff]   ;;  %v1705_v21 = vld [vmem:[%s2173_s1 + $0x2c0] sm:$0xff]   ;;  %v1724_v42 = vld [vmem:[%s2173_s1 + $0x228] sm:$0xff]  }
  0x18   :  { %1468 = vmatprep.subr.bf16.mxu0 %v1662_v24  ;;  %v1702_v17 = vld [vmem:[%s2173_s1 + $0x1b8] sm:$0xff]   ;;  %v1706_v22 = vld [vmem:[%s2173_s1 + $0x280] sm:$0xff]   ;;  %v1707_v24 = vld [vmem:[%s2173_s1 + $0x248] sm:$0xff]  }
  0x19   :  { %1489 = vmatpush3.bf16.msra.mxu1 %v1661_v23  ;;  %v279_v23 = vcombine.high %v263_v18, %v263_v18  ;;  %v1715_v32 = vld [vmem:[%s2173_s1 + $0x258] sm:$0xff]   ;;  %v1719_v36 = vld [vmem:[%s2173_s1 + $0x260] sm:$0xff]   ;;  %v1725_v43 = vld [vmem:[%s2173_s1 + $0x2e8] sm:$0xff]  }
  0x1a   :  { %1490 = vmatprep.subr.bf16.mxu1 %v1664_v26  ;;  %v1709_v26 = vld [vmem:[%s2173_s1 + $0x2c8] sm:$0xff]   ;;  %v1716_v33 = vld [vmem:[%s2173_s1 + $0x218] sm:$0xff]   ;;  %v1721_v38 = vld [vmem:[%s2173_s1 + $0x2e0] sm:$0xff]  }
  0x1b   :  { %1469 = vmatpush3.bf16.msra.mxu0 %v1663_v25  ;;  %v1708_v25 = vld [vmem:[%s2173_s1 + $0x208] sm:$0xff]   ;;  %v1718_v35 = vld [vmem:[%s2173_s1 + $0x298] sm:$0xff]   ;;  %v1722_v39 = vld [vmem:[%s2173_s1 + $0x2a0] sm:$0xff]  }
  0x1c   :  { %1470 = vmatprep.subr.bf16.mxu0 %v1666_v29  ;;  %v1712_v29 = vld [vmem:[%s2173_s1 + $0x210] sm:$0xff]   ;;  %v1726_v44 = vld [vmem:[%s2173_s1 + $0x2a8] sm:$0xff]   ;;  %v1732_v53 = vld [vmem:[%s2173_s1 + $0x238] sm:$0xff]  }
  0x1d   :  { %1491 = vmatpush3.bf16.msra.mxu1 %v1665_v28  ;;  %v1711_v28 = vld [vmem:[%s2173_s1 + $0x250] sm:$0xff]   ;;  %v23_v46 = vld [vmem:[%s2172_s0 + $0x8] sm:$0x1f] }
  0x1e   :  { %1492 = vmatprep.subr.bf16.mxu1 %v1668_v31  ;;  %v1714_v31 = vld [vmem:[%s2173_s1 + $0x290] sm:$0xff]   ;;  %v289_v48 = vrot.slane %v23_v46, %v1911_v41 }
  0x1f   :  { %1471 = vmatpush3.bf16.msra.mxu0 %v1667_v30  ;;  %v1713_v30 = vld [vmem:[%s2173_s1 + $0x2d0] sm:$0xff]  }
  0x20   :  { %1500 = vmatprep.subr.bf16.mxu0 %v1671_v37  ;;  %v1720_v37 = vld [vmem:[%s2173_s1 + $0x220] sm:$0xff]  }
  0x21   :  { %1493 = vmatpush3.bf16.msra.mxu1 %v1670_v34  ;;  %v1717_v34 = vld [vmem:[%s2173_s1 + $0x2d8] sm:$0xff]  }
  0x22   :  { %1522 = vmatprep.subr.bf16.mxu1 %v1673_v40  ;;  %970 = vmatmul.mubr.bf16.vlgmr.msra.gmra.mrb[0].mxu0 %v256_v45  ;;  %v1723_v40 = vld [vmem:[%s2173_s1 + $0x268] sm:$0xff]   ;;  %v1727_v45 = vld [vmem:[%s2173_s1 + $0x270] sm:$0xff]  }
  0x23   :  { %1501 = vmatpush3.bf16.msra.mxu0 %v1672_v47  ;;  %1049 = vmatprep.mubr.bf16.mxu0 %v277_v50  ;;  %v1728_v47 = vld [vmem:[%s2173_s1 + $0x230] sm:$0xff]  }
  0x24   :  { %1010 = vmatmul.mubr.bf16.vlgmr.msra.gmra.mrb[0].mxu1 %v278_v51  ;;  %1502 = vmatprep.subr.bf16.mxu0 %v1675_v52  ;;  %v1730_v50 = vld [vmem:[%s2173_s1 + $0x2b0] sm:$0xff]   ;;  %v297_v51 = vcombine.high %v289_v48, %v289_v48  ;;  %v1731_v52 = vld [vmem:[%s2173_s1 + $0x278] sm:$0xff]  }
  0x25   :  { %1523 = vmatpush3.bf16.msra.mxu1 %v1674_v49  ;;  %1089 = vmatprep.mubr.bf16.mxu1 %v281_v56  ;;  %v1729_v49 = vld [vmem:[%s2173_s1 + $0x2f0] sm:$0xff]   ;;  %v1735_v56 = vld [vmem:[%s2173_s1 + $0x2b8] sm:$0xff]  }
  0x26   :  { %1524 = vmatprep.subr.bf16.mxu1 %v1677_v55  ;;  %v318_v55 = vrot.slane %v297_v51, %v1911_v41 }
  0x27   :  { %1503 = vmatpush3.bf16.msra.mxu0 %v1676_v54  ;;  %v1733_v54 = vld [vmem:[%s2173_s1 + $0x2f8] sm:$0xff]  }
  0x28   :  { %1504 = vmatprep.subr.bf16.mxu0 %v1679_v58  ;;  %v304_v58 = vrot.slane %v289_v48, %v1911_v41 }
  0x29   :  { %1525 = vmatpush3.bf16.msra.mxu1 %v1678_v57  ;;  %v320_v57 = vcombine.high %v318_v55, %v318_v55 }
  0x2a   :  { %1526 = vmatprep.subr.bf16.mxu1 %v1681_v60 }
  0x2b   :  { %1505 = vmatpush3.bf16.msra.mxu0 %v1680_v59  ;;  %v1736_v59 = vld [vmem:[%s2173_s1 + $0x300] sm:$0xff]  }
  0x2c   :  { %1506 = vmatprep.subr.bf16.mxu0 %v1683_v62 }
  0x2d   :  { %1527 = vmatpush3.bf16.msra.mxu1 %v1682_v61 }
  0x2e   :  { %1528 = vmatprep.subr.bf16.mxu1 %v1685_v0 }
  0x2f   :  { %1507 = vmatpush3.bf16.msra.mxu0 %v1684_v63 }
  0x30   :  { %1508 = vmatprep.subr.bf16.mxu0 %v1687_v2 }
  0x31   :  { %1529 = vmatpush3.bf16.msra.mxu1 %v1686_v1 }
  0x32   :  { %1530 = vmatprep.subr.bf16.mxu1 %v1689_v4 }
  0x33   :  { %1509 = vmatpush3.bf16.msra.mxu0 %v1688_v3 }
  0x34   :  { %1510 = vmatprep.subr.bf16.mxu0 %v1691_v6 }
  0x35   :  { %1531 = vmatpush3.bf16.msra.mxu1 %v1690_v5 }
  0x36   :  { %1532 = vmatprep.subr.bf16.mxu1 %v1693_v8 }
  0x37   :  { %1511 = vmatpush3.bf16.msra.mxu0 %v1692_v7 }
  0x38   :  { %1512 = vmatprep.subr.bf16.mxu0 %v1695_v10 }
  0x39   :  { %1533 = vmatpush3.bf16.msra.mxu1 %v1694_v9 }
  0x3a   :  { %1534 = vmatprep.subr.bf16.mxu1 %v1697_v12 }
  0x3b   :  { %1513 = vmatpush3.bf16.msra.mxu0 %v1696_v11 }
  0x3c   :  { %1514 = vmatprep.subr.bf16.mxu0 %v1699_v14 }
  0x3d   :  { %1535 = vmatpush3.bf16.msra.mxu1 %v1698_v13 }
  0x3e   :  { %1536 = vmatprep.subr.bf16.mxu1 %v1701_v16 }
  0x3f   :  { %1515 = vmatpush3.bf16.msra.mxu0 %v1700_v15 }
  0x40   :  { %1544 = vmatprep.subr.bf16.mxu0 %v1703_v19 }
  0x41   :  { %1537 = vmatpush3.bf16.msra.mxu1 %v1702_v17 }
  0x42   :  { %1050 = vmatmul.mubr.bf16.vlgmr.msra.gmra.mrb[4].mxu0 %v263_v18  ;;  %1566 = vmatprep.subr.bf16.mxu1 %v1705_v21 }
  0x43   :  { %1545 = vmatpush3.bf16.msra.mxu0 %v1704_v20  ;;  %1129 = vmatprep.mubr.bf16.mxu0 %v318_v55 }
  0x44   :  { %1090 = vmatmul.mubr.bf16.vlgmr.msra.gmra.mrb[4].mxu1 %v279_v23  ;;  %1546 = vmatprep.subr.bf16.mxu0 %v1707_v24 }
  0x45   :  { %1567 = vmatpush3.bf16.msra.mxu1 %v1706_v22  ;;  %1169 = vmatprep.mubr.bf16.mxu1 %v320_v57 }
  0x46   :  { %1568 = vmatprep.subr.bf16.mxu1 %v1709_v26 }
  0x47   :  { %1547 = vmatpush3.bf16.msra.mxu0 %v1708_v25 }
  0x48   :  { %1548 = vmatprep.subr.bf16.mxu0 %v1711_v28 }
  0x49   :  { %1569 = vmatpush3.bf16.msra.mxu1 %v1710_v27 }
  0x4a   :  { %1570 = vmatprep.subr.bf16.mxu1 %v1713_v30 }
  0x4b   :  { %1549 = vmatpush3.bf16.msra.mxu0 %v1712_v29 }
  0x4c   :  { %1550 = vmatprep.subr.bf16.mxu0 %v1715_v32 }
  0x4d   :  { %1571 = vmatpush3.bf16.msra.mxu1 %v1714_v31 }
  0x4e   :  { %1572 = vmatprep.subr.bf16.mxu1 %v1717_v34 }
  0x4f   :  { %1551 = vmatpush3.bf16.msra.mxu0 %v1716_v33 }
  0x50   :  { %1552 = vmatprep.subr.bf16.mxu0 %v1719_v36 }
  0x51   :  { %1573 = vmatpush3.bf16.msra.mxu1 %v1718_v35 }
  0x52   :  { %1574 = vmatprep.subr.bf16.mxu1 %v1721_v38 }
  0x53   :  { %1553 = vmatpush3.bf16.msra.mxu0 %v1720_v37 }
  0x54   :  { %1554 = vmatprep.subr.bf16.mxu0 %v1723_v40 }
  0x55   :  { %1575 = vmatpush3.bf16.msra.mxu1 %v1722_v39 }
  0x56   :  { %1576 = vmatprep.subr.bf16.mxu1 %v1725_v43 }
  0x57   :  { %1555 = vmatpush3.bf16.msra.mxu0 %v1724_v42 }
  0x58   :  { %1556 = vmatprep.subr.bf16.mxu0 %v1727_v45 }
  0x59   :  { %1577 = vmatpush3.bf16.msra.mxu1 %v1726_v44 }
  0x5a   :  { %1578 = vmatprep.subr.bf16.mxu1 %v1729_v49 }
  0x5b   :  { %1557 = vmatpush3.bf16.msra.mxu0 %v1728_v47 }
  0x5c   :  { %1558 = vmatprep.subr.bf16.mxu0 %v1731_v52 }
  0x5d   :  { %1579 = vmatpush3.bf16.msra.mxu1 %v1730_v50 }
  0x5e   :  { %1580 = vmatprep.subr.bf16.mxu1 %v1733_v54 }
  0x5f   :  { %1559 = vmatpush3.bf16.msra.mxu0 %v1732_v53 }
  0x60   :  { %10 = vsyncpa [#allocation3], 0  ;;  %v1773_v60 = vmov 0.0   ;;  %v319_v61 = vcombine.high %v304_v58, %v304_v58  ;;  %v1737_v62 = vld [vmem:[%s2173_s1 + $0x308] sm:$0xff]   ;;  %vm1774_vm0 = vmmov 0   ;;  %v282_v63 = vcombine.high %v23_v46, %v23_v46  ;;  %v1738_v0 = vld [vmem:[%s2173_s1 + $0x310] sm:$0xff]  }
  0x61   :  { %1602 = vmatprep.subr.bf16.mxu0 %v1773_v60  ;;  %1581 = vmatpush3.bf16.msra.mxu1 %v1735_v56  ;;  %v1739_v2 = vld [vmem:[%s2173_s1 + $0x318] sm:$0xff]   ;;  %vm933_vm1 = vcmask 523264   ;;  %v1740_v4 = vld [vmem:[%s2175_s3] sm:$0xff]   ;;  %v1741_v5 = vld [vmem:[%s2175_s3 + $0x8] sm:$0xff]   ;;  %s1775_s12 = smov [#allocation2]  }
  0x62   :  { %1130 = vmatmul.mubr.bf16.vlgmr.msra.gmra.mrb[8].mxu0 %v304_v58  ;;  %1614 = vmatprep.subr.bf16.mxu1 %v1773_v60  ;;  %v296_v1 = vrot.slane %v282_v63, %v1911_v41  ;;  %v1742_v6 = vld [vmem:[%s2175_s3 + $0x10] sm:$0xff]   ;;  %v1744_v7 = vld [vmem:[%s2175_s3 + $0x20] sm:$0xff]   ;;  %v1745_v8 = vld [vmem:[%s2175_s3 + $0x28] sm:$0xff]   ;;  %s1337_s13 = sshll.u32 %s1775_s12, 4  ;;  %s1338_s13 = int_to_ptr.vmem [resolvable:$true] %s1337_s13 }
  0x63   :  { %1603 = vmatpush3.bf16.msra.mxu0 %v1736_v59  ;;  %1610 = vmatprep.mubr.msk.bf16.mxu0 %vm1774_vm0, %v1773_v60  ;;  %v1746_v9 = vld [vmem:[%s2175_s3 + $0x30] sm:$0xff]   ;;  %v1747_v10 = vld [vmem:[%s2175_s3 + $0x38] sm:$0xff]   ;;  %v1345_v12 = vld [vmem:[%s2174_s2] ss:$0 sm:$0xff]  ;;  %s1748_s14 = scalar_lea.vmem %s1338_s13, 32  ;;  %p1753_p1 = scmp.lt.s32.totalorder %s1338_s13, %s1338_s13 }
  0x64   :  { %1170 = vmatmul.mubr.bf16.vlgmr.msra.gmra.mrb[8].mxu1 %v319_v61  ;;  %1604 = vmatprep.subr.bf16.mxu0 %v1773_v60  ;;  %v311_v3 = vrot.slane %v296_v1, %v1911_v41  ;;  %v1743_v41 = vld [vmem:[%s2175_s3 + $0x18] sm:$0xff]   ;;  %v1447_v56 = vld [vmem:[%s2176_s4] ss:$0 sm:$0xff]  ;;  %p1749_p0 = scmp.ne.s32.totalorder %s1338_s13, %s1748_s14  ;;  %p1754_p2 = scmp.lt.s32.totalorder %s1748_s14, %s1748_s14 }
  0x65   :  { %1630 = vmatprep.mubr.msk.bf16.mxu1 %vm1774_vm0, %v1773_v60  ;;  %1615 = vmatpush3.bf16.msra.mxu1 %v1740_v4 }
  0x66   :  { %1616 = vmatprep.subr.bf16.mxu1 %v1773_v60  ;;  %p1755_p3 = por %p1754_p2, %p1753_p1 }
  0x67   :  { %1605 = vmatpush3.bf16.msra.mxu0 %v1737_v62 }
  0x68   :  { %1606 = vmatprep.subr.bf16.mxu0 %v1773_v60  ;;  %p1756_p4 = pnand %p1755_p3, %p1749_p0 }
  0x69   :  { %1617 = vmatpush3.bf16.msra.mxu1 %v1741_v5 }
  0x6a   :  { %1618 = vmatprep.subr.bf16.mxu1 %v1773_v60 }
  0x6b   :  { %1607 = vmatpush3.bf16.msra.mxu0 %v1738_v0 }
  0x6c   :  { %1608 = vmatprep.subr.bf16.mxu0 %v1773_v60 }
  0x6d   :  { %1619 = vmatpush3.bf16.msra.mxu1 %v1742_v6 }
  0x6e   :  { %1620 = vmatprep.subr.bf16.mxu1 %v1773_v60 }
  0x6f   :  { %1609 = vmatpush3.bf16.msra.mxu0 %v1739_v2 }
  0x71   :  { %1621 = vmatpush3.bf16.msra.mxu1 %v1743_v41 }
  0x72   :  { %1611 = vmatmul.mubr.msk.bf16.vlgmr.msra.gmra.mrb[12].mxu0 %vm933_vm1, %v311_v3  ;;  %1622 = vmatprep.subr.bf16.mxu1 %v1773_v60 }
  0x75   :  { %1623 = vmatpush3.bf16.msra.mxu1 %v1744_v7 }
  0x76   :  { %1624 = vmatprep.subr.bf16.mxu1 %v1773_v60 }
  0x79   :  { %1625 = vmatpush3.bf16.msra.mxu1 %v1745_v8 }
  0x7a   :  { %1626 = vmatprep.subr.bf16.mxu1 %v1773_v60 }
  0x7d   :  { %1627 = vmatpush3.bf16.msra.mxu1 %v1746_v9 }
  0x7e   :  { %1628 = vmatprep.subr.bf16.mxu1 %v1773_v60 }
  0x81   :  { %1629 = vmatpush3.bf16.msra.mxu1 %v1747_v10 }
  0xf5   :  { %v1472_v11 = vpop.f32.mrb[0].mxu0 }
  0xf6   :  { %v1473_v13 = vpop.f32.mrb[1].mxu0 }
  0xf7   :  { %v1474_v14 = vadd.f32 %v1473_v13, %v1472_v11  ;;  %v1475_v15 = vpop.f32.mrb[2].mxu0  ;;  %v1494_v16 = vpop.f32.mrb[0].mxu1 }
  0xf8   :  { %v1476_v17 = vpop.f32.mrb[3].mxu0  ;;  %v1495_v18 = vpop.f32.mrb[1].mxu1 }
  0xf9   :  { %v972_v19 = vadd.f32 %v1474_v14, %v1345_v12  ;;  %v1496_v20 = vadd.f32 %v1495_v18, %v1494_v16  ;;  %v1497_v21 = vpop.f32.mrb[2].mxu1 }
  0xfa   :  { %v1498_v22 = vpop.f32.mrb[3].mxu1 }
  0xfb   :  { %v1012_v23 = vadd.f32 %v1496_v20, %v972_v19 }
 0x115   :  { %v1516_v24 = vpop.f32.mrb[4].mxu0 }
 0x116   :  { %v1517_v25 = vpop.f32.mrb[5].mxu0 }
 0x117   :  { %v1518_v26 = vadd.f32 %v1517_v25, %v1516_v24  ;;  %v1519_v27 = vpop.f32.mrb[6].mxu0  ;;  %v1538_v28 = vpop.f32.mrb[4].mxu1 }
 0x118   :  { %v1520_v29 = vpop.f32.mrb[7].mxu0  ;;  %v1539_v30 = vpop.f32.mrb[5].mxu1 }
 0x119   :  { %v1052_v31 = vadd.f32 %v1518_v26, %v1012_v23  ;;  %v1540_v32 = vadd.f32 %v1539_v30, %v1538_v28  ;;  %v1541_v33 = vpop.f32.mrb[6].mxu1 }
 0x11a   :  { %v1542_v34 = vpop.f32.mrb[7].mxu1 }
 0x11b   :  { %v1092_v35 = vadd.f32 %v1540_v32, %v1052_v31 }
 0x135   :  { %v1560_v36 = vpop.f32.mrb[8].mxu0 }
 0x136   :  { %v1561_v37 = vpop.f32.mrb[9].mxu0 }
 0x137   :  { %v1562_v38 = vadd.f32 %v1561_v37, %v1560_v36  ;;  %v1563_v39 = vpop.f32.mrb[10].mxu0  ;;  %v1582_v40 = vpop.f32.mrb[8].mxu1 }
 0x138   :  { %v1564_v42 = vpop.f32.mrb[11].mxu0  ;;  %v1583_v43 = vpop.f32.mrb[9].mxu1 }
 0x139   :  { %v1132_v44 = vadd.f32 %v1562_v38, %v1092_v35  ;;  %v1584_v45 = vadd.f32 %v1583_v43, %v1582_v40  ;;  %v1585_v46 = vpop.f32.mrb[10].mxu1 }
 0x13a   :  { %v1586_v47 = vpop.f32.mrb[11].mxu1 }
 0x13b   :  { %v1172_v48 = vadd.f32 %v1584_v45, %v1132_v44 }
 0x145   :  { %v1211_v49 = vpop.f32.mrb[12].mxu0 }
 0x146   :  { %v1212_v50 = vadd.f32 %v1211_v49, %v1172_v48  ;;  %v1612_v51 = vpop.f32.mrb[13].mxu0 }
 0x147   :  { %v1214_v52 = vpop.f32.mrb[14].mxu0 }
 0x148   :  { %v1217_v53 = vmax.f32 %v1212_v50, 0.0  ;;  %v1613_v54 = vpop.f32.mrb[15].mxu0 }
 0x14a   :  { %v1218_v55 = vpack.c.bf16 %v1217_v53, %v1217_v53 }
 0x14c   :  { %1631 = vmatmul.mubr.bf16.vlgmr.msra.gmra.mrb[12].mxu1 %v1218_v55 }
 0x21f   :  { %v1324_v57 = vpop.f32.mrb[12].mxu1 }
 0x220   :  { %v1325_v58 = vadd.f32 %v1447_v56, %v1324_v57  ;;  %v1632_v59 = vpop.f32.mrb[13].mxu1 }
 0x221   :  { %v1327_v60 = vpop.f32.mrb[14].mxu1 }
 0x222   :  { %1330 = vst [vmem:[#allocation2] sm:$0x3] %v1325_v58  ;;  %v1633_v61 = vpop.f32.mrb[15].mxu1 }
 0x223   :  { %1759 = shalt.err (!%p1756_p4)
}
 0x224   :  { %s1760_s4 = scalar_lea.hbm %s2177_s5, 32 }
 0x225   :  { %p1761_p5 = scmp.ne.s32.totalorder %s2177_s5, %s1760_s4  ;;  %p1764_p6 = scmp.lt.u32.totalorder %s1760_s4, %s2177_s5 }
 0x227   :  { %p1766_p7 = pnand %p1764_p6, %p1761_p5 }
 0x229   :  { %1769 = shalt.err (!%p1766_p7)
}
 0x22a   :  { %1340 = dma.vmem_to_hbm [thread:$0]  %s1338_s13, 32, %s2177_s5, [#allocation3]  }
 0x22b   :  { %1770 = dma.done.wait [#allocation3], 32  }
 0x22c   :  { %1771 = vsyncadd [#allocation3], 4294967264 }
 0x22d   :  { %1344 = vsyncpa [#allocation3], 1 }

</bundles_post_ra>
